<compile_context>
chip_gen: v7x
topology: tpu7x:2x2x1
jax: 0.10.0
libtpu: 0.0.40
codegen_flags: <defaults>
</compile_context>

<pallas_src>
import jax
import jax.numpy as jnp
from jax.experimental import pallas as pl
from jax.experimental.pallas import tpu as pltpu

NUM_LAYERS = 2     # get_constants('num_layers')
OUTPUT_SIZE = 5    # get_constants('output_size')


def binary_dnn_kernel(x_ref, h_ref,
                      wih0_ref, whh0_ref, b0_ref,
                      wih1_ref, whh1_ref, b1_ref,
                      wout_ref, bout_ref,
                      out_ref,
                      xw0_ref):
    # x_ref : (T*BP, I) f32, time-major flattened input (batch padded to BP)
    # h_ref : (2, BP, H) f32 initial hidden states
    # wih0  : (I, H) bf16    whh0 : (H, H) bf16    b0 : (1, H) f32 (= bih0+bhh0)
    # wih1  : (H, H) bf16    whh1 : (H, H) bf16    b1 : (1, H) f32 (= bih1+bhh1)
    # wout  : (H, O) bf16                          bout: (1, O) f32
    # xw0_ref: (T, BP, H) f32 VMEM scratch (hoisted layer-0 input projection)
    T, BP, H = xw0_ref.shape

    # ---- Hoisted layer-0 input projection: one matmul for all timesteps ----
    x_bf = x_ref[...].astype(jnp.bfloat16)
    xw0_ref[...] = (
        jnp.dot(x_bf, wih0_ref[...], preferred_element_type=jnp.float32)
        + b0_ref[...]
    ).reshape(T, BP, H)

    # Hoist the b1 broadcast out of the unrolled loop (no CSE of broadcasts).
    b1b = jnp.broadcast_to(b1_ref[...], (BP, H))

    h0 = h_ref[0]              # (BP, H) f32
    h1 = h_ref[1]              # (BP, H) f32

    # ---- Fully-unrolled recurrence over T (static, small) ----
    for t in range(T):
        # h1 @ whh1 depends only on h1 from step t-1: issue it first so the MXU
        # work overlaps layer-0's matmul + tanh for this step.
        h1_rec = jnp.dot(h1.astype(jnp.bfloat16), whh1_ref[...],
                         preferred_element_type=jnp.float32)
        h0 = jnp.tanh(
            xw0_ref[t]
            + jnp.dot(h0.astype(jnp.bfloat16), whh0_ref[...],
                      preferred_element_type=jnp.float32))
        h1 = jnp.tanh(
            jnp.dot(h0.astype(jnp.bfloat16), wih1_ref[...],
                    preferred_element_type=jnp.float32)
            + h1_rec + b1b)

    # output[:, -1, :] of the top RNN layer == h1; then Linear + Softmax(dim=1)
    logits = (jnp.dot(h1.astype(jnp.bfloat16), wout_ref[...],
                      preferred_element_type=jnp.float32)
              + bout_ref[...])                                     # (BP, O) f32

    m = jnp.max(logits, axis=-1, keepdims=True)
    e = jnp.exp(logits - m)
    out_ref[...] = e / jnp.sum(e, axis=-1, keepdims=True)          # exact divide


def binary_dnn_forward(x, h0, params):
    """x: (B, T, I) f32; h0: (num_layers, B, H) f32; params: packed (see pack_params)."""
    B, T, I = x.shape
    H = h0.shape[-1]
    # Pad batch to the f32 sublane multiple so every per-step slice is an
    # aligned (8,128) tile (free on the MXU; padded rows are discarded).
    BP = 8 * pl.cdiv(B, 8)
    pad = BP - B
    xp = jnp.pad(x, ((0, pad), (0, 0), (0, 0)))
    hp = jnp.pad(h0, ((0, 0), (0, pad), (0, 0)))
    # Time-major, flattened layout so the kernel does one big input projection.
    x2 = jnp.transpose(xp, (1, 0, 2)).reshape(T * BP, I)

    vmem = pl.BlockSpec(memory_space=pltpu.MemorySpace.VMEM)
    out = pl.pallas_call(
        binary_dnn_kernel,
        out_shape=jax.ShapeDtypeStruct((BP, OUTPUT_SIZE), jnp.float32),
        in_specs=[vmem] * 10,
        out_specs=vmem,
        scratch_shapes=[pltpu.VMEM((T, BP, H), jnp.float32)],
    )(x2, hp,
      params["wih0"], params["whh0"], params["b0"],
      params["wih1"], params["whh1"], params["b1"],
      params["wout"], params["bout"])
    return out[:B]


def init_params(key, input_size, hidden_size):
    """PyTorch-style U(-1/sqrt(H), 1/sqrt(H)) init; weights stored (in, out)."""
    H, I, O = hidden_size, input_size, OUTPUT_SIZE
    bound = 1.0 / jnp.sqrt(jnp.float32(H))
    ks = jax.random.split(key, 10)
    u = lambda k, shape: jax.random.uniform(k, shape, jnp.float32, -bound, bound)
    return {
        "wih0": u(ks[0], (I, H)), "whh0": u(ks[1], (H, H)),
        "bih0": u(ks[2], (1, H)), "bhh0": u(ks[3], (1, H)),
        "wih1": u(ks[4], (H, H)), "whh1": u(ks[5], (H, H)),
        "bih1": u(ks[6], (1, H)), "bhh1": u(ks[7], (1, H)),
        "wout": u(ks[8], (H, O)), "bout": u(ks[9], (1, O)),
    }


def pack_params(p):
    """Fold biases, cast matmul operands to bf16 (layer-1 weights kept separate)."""
    return {
        "wih0": p["wih0"].astype(jnp.bfloat16),
        "whh0": p["whh0"].astype(jnp.bfloat16),
        "b0": (p["bih0"] + p["bhh0"]).astype(jnp.float32),
        "wih1": p["wih1"].astype(jnp.bfloat16),
        "whh1": p["whh1"].astype(jnp.bfloat16),
        "b1": (p["bih1"] + p["bhh1"]).astype(jnp.float32),
        "wout": p["wout"].astype(jnp.bfloat16),
        "bout": p["bout"].astype(jnp.float32),
    }


def reference_forward(x, h, pk):
    """Pure-JAX reference (f32 math, same bf16-rounded weights)."""
    B, T, I = x.shape
    h0, h1 = h[0], h[1]
    wih0 = pk["wih0"].astype(jnp.float32)
    whh0 = pk["whh0"].astype(jnp.float32)
    wih1 = pk["wih1"].astype(jnp.float32)
    whh1 = pk["whh1"].astype(jnp.float32)
    wout = pk["wout"].astype(jnp.float32)
    for t in range(T):
        x_t = x[:, t, :]
        h0 = jnp.tanh(x_t @ wih0 + pk["b0"] + h0 @ whh0)
        h1 = jnp.tanh(h0 @ wih1 + h1 @ whh1 + pk["b1"])
    logits = h1 @ wout + pk["bout"]
    return jax.nn.softmax(logits, axis=-1)


if __name__ == "__main__":
    batch, seq, input_size = 2, 8, 16
    hidden_size = 128   # get_constants('hidden_size')

    key = jax.random.PRNGKey(0)
    k_x, k_p = jax.random.split(key)

    x = jax.random.normal(k_x, (batch, seq, input_size), jnp.float32)
    # initHidden analogue: zero initial hidden state, one per layer.
    h0 = jnp.zeros((NUM_LAYERS, batch, hidden_size), jnp.float32)
    params = pack_params(init_params(k_p, input_size, hidden_size))

    out = binary_dnn_forward(x, h0, params)
    out = jax.block_until_ready(out)

    assert out.shape == (batch, OUTPUT_SIZE)
    assert bool(jnp.all(jnp.isfinite(out)))
    # exact divide in the softmax -> rows sum to 1 tightly
    assert jnp.allclose(jnp.sum(out, axis=-1), 1.0, atol=1e-5)
    # match a pure-JAX reference (bf16 MXU operands => loose tolerance)
    ref = reference_forward(x, h0, params)
    assert jnp.allclose(out, ref, atol=5e-2), (out, ref)
    print("KERNEL_OK")
</pallas_src>

<mosaic_0001>
module attributes {stable_mosaic.version = 11 : i64} {
  func.func @binary_dnn_kernel(%arg0: memref<64x16xf32, #tpu.memory_space<vmem>>, %arg1: memref<2x8x128xf32, #tpu.memory_space<vmem>>, %arg2: memref<16x128xbf16, #tpu.memory_space<vmem>>, %arg3: memref<128x128xbf16, #tpu.memory_space<vmem>>, %arg4: memref<1x128xf32, #tpu.memory_space<vmem>>, %arg5: memref<128x128xbf16, #tpu.memory_space<vmem>>, %arg6: memref<128x128xbf16, #tpu.memory_space<vmem>>, %arg7: memref<1x128xf32, #tpu.memory_space<vmem>>, %arg8: memref<128x5xbf16, #tpu.memory_space<vmem>>, %arg9: memref<1x5xf32, #tpu.memory_space<vmem>>, %arg10: memref<8x5xf32, #tpu.memory_space<vmem>>, %arg11: memref<8x8x128xf32, #tpu.memory_space<vmem>>) attributes {dimension_semantics = [], scalar_prefetch = 0 : i64, scratch_operands = 1 : i64, tpu.core_type = #tpu.core_type<tc>} {
    %c0 = arith.constant 0 : index
    %c0_0 = arith.constant 0 : index
    %0 = vector.load %arg0[%c0, %c0_0] : memref<64x16xf32, #tpu.memory_space<vmem>>, vector<64x16xf32>
    %1 = arith.truncf %0 : vector<64x16xf32> to vector<64x16xbf16>
    %c0_1 = arith.constant 0 : index
    %c0_2 = arith.constant 0 : index
    %2 = vector.load %arg2[%c0_1, %c0_2] : memref<16x128xbf16, #tpu.memory_space<vmem>>, vector<16x128xbf16>
    %cst = arith.constant dense<0.000000e+00> : vector<64x128xf32>
    %3 = tpu.matmul %1, %2, %cst {dimension_numbers = #tpu.dot_dimension_numbers<[1], [0], [0], [1], [0, 0, 1, 1], [], []>} : vector<64x16xbf16>, vector<16x128xbf16>, vector<64x128xf32> -> vector<64x128xf32>
    %c0_3 = arith.constant 0 : index
    %c0_4 = arith.constant 0 : index
    %4 = vector.load %arg4[%c0_3, %c0_4] : memref<1x128xf32, #tpu.memory_space<vmem>>, vector<1x128xf32>
    %5 = vector.broadcast %4 : vector<1x128xf32> to vector<64x128xf32>
    %6 = arith.addf %3, %5 : vector<64x128xf32>
    %7 = vector.shape_cast %6 : vector<64x128xf32> to vector<8x8x128xf32>
    %c0_5 = arith.constant 0 : index
    %c0_6 = arith.constant 0 : index
    %c0_7 = arith.constant 0 : index
    %8 = vector.load %arg11[%c0_5, %c0_6, %c0_7] : memref<8x8x128xf32, #tpu.memory_space<vmem>>, vector<8x8x128xf32>
    tpu.vector_store %arg11[%c0_5, %c0_6, %c0_7], %7 {strides = array<i32>} : memref<8x8x128xf32, #tpu.memory_space<vmem>>, vector<8x8x128xf32>,
    %c0_8 = arith.constant 0 : index
    %c0_9 = arith.constant 0 : index
    %9 = vector.load %arg7[%c0_8, %c0_9] : memref<1x128xf32, #tpu.memory_space<vmem>>, vector<1x128xf32>
    %10 = vector.shape_cast %9 : vector<1x128xf32> to vector<1x128xf32>
    %11 = vector.broadcast %10 : vector<1x128xf32> to vector<8x128xf32>
    %c0_10 = arith.constant 0 : index
    %c0_11 = arith.constant 0 : index
    %c0_12 = arith.constant 0 : index
    %12 = vector.load %arg1[%c0_10, %c0_11, %c0_12] : memref<2x8x128xf32, #tpu.memory_space<vmem>>, vector<1x8x128xf32>
    %13 = vector.shape_cast %12 : vector<1x8x128xf32> to vector<8x128xf32>
    %c1 = arith.constant 1 : index
    %c0_13 = arith.constant 0 : index
    %c0_14 = arith.constant 0 : index
    %14 = vector.load %arg1[%c1, %c0_13, %c0_14] : memref<2x8x128xf32, #tpu.memory_space<vmem>>, vector<1x8x128xf32>
    %15 = vector.shape_cast %14 : vector<1x8x128xf32> to vector<8x128xf32>
    %16 = arith.truncf %15 : vector<8x128xf32> to vector<8x128xbf16>
    %c0_15 = arith.constant 0 : index
    %c0_16 = arith.constant 0 : index
    %17 = vector.load %arg6[%c0_15, %c0_16] : memref<128x128xbf16, #tpu.memory_space<vmem>>, vector<128x128xbf16>
    %cst_17 = arith.constant dense<0.000000e+00> : vector<8x128xf32>
    %18 = tpu.matmul %16, %17, %cst_17 {dimension_numbers = #tpu.dot_dimension_numbers<[1], [0], [0], [1], [0, 0, 1, 1], [], []>} : vector<8x128xbf16>, vector<128x128xbf16>, vector<8x128xf32> -> vector<8x128xf32>
    %c0_18 = arith.constant 0 : index
    %c0_19 = arith.constant 0 : index
    %c0_20 = arith.constant 0 : index
    %19 = vector.load %arg11[%c0_18, %c0_19, %c0_20] : memref<8x8x128xf32, #tpu.memory_space<vmem>>, vector<1x8x128xf32>
    %20 = vector.shape_cast %19 : vector<1x8x128xf32> to vector<8x128xf32>
    %21 = arith.truncf %13 : vector<8x128xf32> to vector<8x128xbf16>
    %c0_21 = arith.constant 0 : index
    %c0_22 = arith.constant 0 : index
    %22 = vector.load %arg3[%c0_21, %c0_22] : memref<128x128xbf16, #tpu.memory_space<vmem>>, vector<128x128xbf16>
    %cst_23 = arith.constant dense<0.000000e+00> : vector<8x128xf32>
    %23 = tpu.matmul %21, %22, %cst_23 {dimension_numbers = #tpu.dot_dimension_numbers<[1], [0], [0], [1], [0, 0, 1, 1], [], []>} : vector<8x128xbf16>, vector<128x128xbf16>, vector<8x128xf32> -> vector<8x128xf32>
    %24 = arith.addf %20, %23 : vector<8x128xf32>
    %25 = math.tanh %24 : vector<8x128xf32>
    %26 = arith.truncf %25 : vector<8x128xf32> to vector<8x128xbf16>
    %c0_24 = arith.constant 0 : index
    %c0_25 = arith.constant 0 : index
    %27 = vector.load %arg5[%c0_24, %c0_25] : memref<128x128xbf16, #tpu.memory_space<vmem>>, vector<128x128xbf16>
    %cst_26 = arith.constant dense<0.000000e+00> : vector<8x128xf32>
    %28 = tpu.matmul %26, %27, %cst_26 {dimension_numbers = #tpu.dot_dimension_numbers<[1], [0], [0], [1], [0, 0, 1, 1], [], []>} : vector<8x128xbf16>, vector<128x128xbf16>, vector<8x128xf32> -> vector<8x128xf32>
    %29 = arith.addf %28, %18 : vector<8x128xf32>
    %30 = arith.addf %29, %11 : vector<8x128xf32>
    %31 = math.tanh %30 : vector<8x128xf32>
    %32 = arith.truncf %31 : vector<8x128xf32> to vector<8x128xbf16>
    %c0_27 = arith.constant 0 : index
    %c0_28 = arith.constant 0 : index
    %33 = vector.load %arg6[%c0_27, %c0_28] : memref<128x128xbf16, #tpu.memory_space<vmem>>, vector<128x128xbf16>
    %cst_29 = arith.constant dense<0.000000e+00> : vector<8x128xf32>
    %34 = tpu.matmul %32, %33, %cst_29 {dimension_numbers = #tpu.dot_dimension_numbers<[1], [0], [0], [1], [0, 0, 1, 1], [], []>} : vector<8x128xbf16>, vector<128x128xbf16>, vector<8x128xf32> -> vector<8x128xf32>
    %c1_30 = arith.constant 1 : index
    %c0_31 = arith.constant 0 : index
    %c0_32 = arith.constant 0 : index
    %35 = vector.load %arg11[%c1_30, %c0_31, %c0_32] : memref<8x8x128xf32, #tpu.memory_space<vmem>>, vector<1x8x128xf32>
    %36 = vector.shape_cast %35 : vector<1x8x128xf32> to vector<8x128xf32>
    %37 = arith.truncf %25 : vector<8x128xf32> to vector<8x128xbf16>
    %c0_33 = arith.constant 0 : index
    %c0_34 = arith.constant 0 : index
    %38 = vector.load %arg3[%c0_33, %c0_34] : memref<128x128xbf16, #tpu.memory_space<vmem>>, vector<128x128xbf16>
    %cst_35 = arith.constant dense<0.000000e+00> : vector<8x128xf32>
    %39 = tpu.matmul %37, %38, %cst_35 {dimension_numbers = #tpu.dot_dimension_numbers<[1], [0], [0], [1], [0, 0, 1, 1], [], []>} : vector<8x128xbf16>, vector<128x128xbf16>, vector<8x128xf32> -> vector<8x128xf32>
    %40 = arith.addf %36, %39 : vector<8x128xf32>
    %41 = math.tanh %40 : vector<8x128xf32>
    %42 = arith.truncf %41 : vector<8x128xf32> to vector<8x128xbf16>
    %c0_36 = arith.constant 0 : index
    %c0_37 = arith.constant 0 : index
    %43 = vector.load %arg5[%c0_36, %c0_37] : memref<128x128xbf16, #tpu.memory_space<vmem>>, vector<128x128xbf16>
    %cst_38 = arith.constant dense<0.000000e+00> : vector<8x128xf32>
    %44 = tpu.matmul %42, %43, %cst_38 {dimension_numbers = #tpu.dot_dimension_numbers<[1], [0], [0], [1], [0, 0, 1, 1], [], []>} : vector<8x128xbf16>, vector<128x128xbf16>, vector<8x128xf32> -> vector<8x128xf32>
    %45 = arith.addf %44, %34 : vector<8x128xf32>
    %46 = arith.addf %45, %11 : vector<8x128xf32>
    %47 = math.tanh %46 : vector<8x128xf32>
    %48 = arith.truncf %47 : vector<8x128xf32> to vector<8x128xbf16>
    %c0_39 = arith.constant 0 : index
    %c0_40 = arith.constant 0 : index
    %49 = vector.load %arg6[%c0_39, %c0_40] : memref<128x128xbf16, #tpu.memory_space<vmem>>, vector<128x128xbf16>
    %cst_41 = arith.constant dense<0.000000e+00> : vector<8x128xf32>
    %50 = tpu.matmul %48, %49, %cst_41 {dimension_numbers = #tpu.dot_dimension_numbers<[1], [0], [0], [1], [0, 0, 1, 1], [], []>} : vector<8x128xbf16>, vector<128x128xbf16>, vector<8x128xf32> -> vector<8x128xf32>
    %c2 = arith.constant 2 : index
    %c0_42 = arith.constant 0 : index
    %c0_43 = arith.constant 0 : index
    %51 = vector.load %arg11[%c2, %c0_42, %c0_43] : memref<8x8x128xf32, #tpu.memory_space<vmem>>, vector<1x8x128xf32>
    %52 = vector.shape_cast %51 : vector<1x8x128xf32> to vector<8x128xf32>
    %53 = arith.truncf %41 : vector<8x128xf32> to vector<8x128xbf16>
    %c0_44 = arith.constant 0 : index
    %c0_45 = arith.constant 0 : index
    %54 = vector.load %arg3[%c0_44, %c0_45] : memref<128x128xbf16, #tpu.memory_space<vmem>>, vector<128x128xbf16>
    %cst_46 = arith.constant dense<0.000000e+00> : vector<8x128xf32>
    %55 = tpu.matmul %53, %54, %cst_46 {dimension_numbers = #tpu.dot_dimension_numbers<[1], [0], [0], [1], [0, 0, 1, 1], [], []>} : vector<8x128xbf16>, vector<128x128xbf16>, vector<8x128xf32> -> vector<8x128xf32>
    %56 = arith.addf %52, %55 : vector<8x128xf32>
    %57 = math.tanh %56 : vector<8x128xf32>
    %58 = arith.truncf %57 : vector<8x128xf32> to vector<8x128xbf16>
    %c0_47 = arith.constant 0 : index
    %c0_48 = arith.constant 0 : index
    %59 = vector.load %arg5[%c0_47, %c0_48] : memref<128x128xbf16, #tpu.memory_space<vmem>>, vector<128x128xbf16>
    %cst_49 = arith.constant dense<0.000000e+00> : vector<8x128xf32>
    %60 = tpu.matmul %58, %59, %cst_49 {dimension_numbers = #tpu.dot_dimension_numbers<[1], [0], [0], [1], [0, 0, 1, 1], [], []>} : vector<8x128xbf16>, vector<128x128xbf16>, vector<8x128xf32> -> vector<8x128xf32>
    %61 = arith.addf %60, %50 : vector<8x128xf32>
    %62 = arith.addf %61, %11 : vector<8x128xf32>
    %63 = math.tanh %62 : vector<8x128xf32>
    %64 = arith.truncf %63 : vector<8x128xf32> to vector<8x128xbf16>
    %c0_50 = arith.constant 0 : index
    %c0_51 = arith.constant 0 : index
    %65 = vector.load %arg6[%c0_50, %c0_51] : memref<128x128xbf16, #tpu.memory_space<vmem>>, vector<128x128xbf16>
    %cst_52 = arith.constant dense<0.000000e+00> : vector<8x128xf32>
    %66 = tpu.matmul %64, %65, %cst_52 {dimension_numbers = #tpu.dot_dimension_numbers<[1], [0], [0], [1], [0, 0, 1, 1], [], []>} : vector<8x128xbf16>, vector<128x128xbf16>, vector<8x128xf32> -> vector<8x128xf32>
    %c3 = arith.constant 3 : index
    %c0_53 = arith.constant 0 : index
    %c0_54 = arith.constant 0 : index
    %67 = vector.load %arg11[%c3, %c0_53, %c0_54] : memref<8x8x128xf32, #tpu.memory_space<vmem>>, vector<1x8x128xf32>
    %68 = vector.shape_cast %67 : vector<1x8x128xf32> to vector<8x128xf32>
    %69 = arith.truncf %57 : vector<8x128xf32> to vector<8x128xbf16>
    %c0_55 = arith.constant 0 : index
    %c0_56 = arith.constant 0 : index
    %70 = vector.load %arg3[%c0_55, %c0_56] : memref<128x128xbf16, #tpu.memory_space<vmem>>, vector<128x128xbf16>
    %cst_57 = arith.constant dense<0.000000e+00> : vector<8x128xf32>
    %71 = tpu.matmul %69, %70, %cst_57 {dimension_numbers = #tpu.dot_dimension_numbers<[1], [0], [0], [1], [0, 0, 1, 1], [], []>} : vector<8x128xbf16>, vector<128x128xbf16>, vector<8x128xf32> -> vector<8x128xf32>
    %72 = arith.addf %68, %71 : vector<8x128xf32>
    %73 = math.tanh %72 : vector<8x128xf32>
    %74 = arith.truncf %73 : vector<8x128xf32> to vector<8x128xbf16>
    %c0_58 = arith.constant 0 : index
    %c0_59 = arith.constant 0 : index
    %75 = vector.load %arg5[%c0_58, %c0_59] : memref<128x128xbf16, #tpu.memory_space<vmem>>, vector<128x128xbf16>
    %cst_60 = arith.constant dense<0.000000e+00> : vector<8x128xf32>
    %76 = tpu.matmul %74, %75, %cst_60 {dimension_numbers = #tpu.dot_dimension_numbers<[1], [0], [0], [1], [0, 0, 1, 1], [], []>} : vector<8x128xbf16>, vector<128x128xbf16>, vector<8x128xf32> -> vector<8x128xf32>
    %77 = arith.addf %76, %66 : vector<8x128xf32>
    %78 = arith.addf %77, %11 : vector<8x128xf32>
    %79 = math.tanh %78 : vector<8x128xf32>
    %80 = arith.truncf %79 : vector<8x128xf32> to vector<8x128xbf16>
    %c0_61 = arith.constant 0 : index
    %c0_62 = arith.constant 0 : index
    %81 = vector.load %arg6[%c0_61, %c0_62] : memref<128x128xbf16, #tpu.memory_space<vmem>>, vector<128x128xbf16>
    %cst_63 = arith.constant dense<0.000000e+00> : vector<8x128xf32>
    %82 = tpu.matmul %80, %81, %cst_63 {dimension_numbers = #tpu.dot_dimension_numbers<[1], [0], [0], [1], [0, 0, 1, 1], [], []>} : vector<8x128xbf16>, vector<128x128xbf16>, vector<8x128xf32> -> vector<8x128xf32>
    %c4 = arith.constant 4 : index
    %c0_64 = arith.constant 0 : index
    %c0_65 = arith.constant 0 : index
    %83 = vector.load %arg11[%c4, %c0_64, %c0_65] : memref<8x8x128xf32, #tpu.memory_space<vmem>>, vector<1x8x128xf32>
    %84 = vector.shape_cast %83 : vector<1x8x128xf32> to vector<8x128xf32>
    %85 = arith.truncf %73 : vector<8x128xf32> to vector<8x128xbf16>
    %c0_66 = arith.constant 0 : index
    %c0_67 = arith.constant 0 : index
    %86 = vector.load %arg3[%c0_66, %c0_67] : memref<128x128xbf16, #tpu.memory_space<vmem>>, vector<128x128xbf16>
    %cst_68 = arith.constant dense<0.000000e+00> : vector<8x128xf32>
    %87 = tpu.matmul %85, %86, %cst_68 {dimension_numbers = #tpu.dot_dimension_numbers<[1], [0], [0], [1], [0, 0, 1, 1], [], []>} : vector<8x128xbf16>, vector<128x128xbf16>, vector<8x128xf32> -> vector<8x128xf32>
    %88 = arith.addf %84, %87 : vector<8x128xf32>
    %89 = math.tanh %88 : vector<8x128xf32>
    %90 = arith.truncf %89 : vector<8x128xf32> to vector<8x128xbf16>
    %c0_69 = arith.constant 0 : index
    %c0_70 = arith.constant 0 : index
    %91 = vector.load %arg5[%c0_69, %c0_70] : memref<128x128xbf16, #tpu.memory_space<vmem>>, vector<128x128xbf16>
    %cst_71 = arith.constant dense<0.000000e+00> : vector<8x128xf32>
    %92 = tpu.matmul %90, %91, %cst_71 {dimension_numbers = #tpu.dot_dimension_numbers<[1], [0], [0], [1], [0, 0, 1, 1], [], []>} : vector<8x128xbf16>, vector<128x128xbf16>, vector<8x128xf32> -> vector<8x128xf32>
    %93 = arith.addf %92, %82 : vector<8x128xf32>
    %94 = arith.addf %93, %11 : vector<8x128xf32>
    %95 = math.tanh %94 : vector<8x128xf32>
    %96 = arith.truncf %95 : vector<8x128xf32> to vector<8x128xbf16>
    %c0_72 = arith.constant 0 : index
    %c0_73 = arith.constant 0 : index
    %97 = vector.load %arg6[%c0_72, %c0_73] : memref<128x128xbf16, #tpu.memory_space<vmem>>, vector<128x128xbf16>
    %cst_74 = arith.constant dense<0.000000e+00> : vector<8x128xf32>
    %98 = tpu.matmul %96, %97, %cst_74 {dimension_numbers = #tpu.dot_dimension_numbers<[1], [0], [0], [1], [0, 0, 1, 1], [], []>} : vector<8x128xbf16>, vector<128x128xbf16>, vector<8x128xf32> -> vector<8x128xf32>
    %c5 = arith.constant 5 : index
    %c0_75 = arith.constant 0 : index
    %c0_76 = arith.constant 0 : index
    %99 = vector.load %arg11[%c5, %c0_75, %c0_76] : memref<8x8x128xf32, #tpu.memory_space<vmem>>, vector<1x8x128xf32>
    %100 = vector.shape_cast %99 : vector<1x8x128xf32> to vector<8x128xf32>
    %101 = arith.truncf %89 : vector<8x128xf32> to vector<8x128xbf16>
    %c0_77 = arith.constant 0 : index
    %c0_78 = arith.constant 0 : index
    %102 = vector.load %arg3[%c0_77, %c0_78] : memref<128x128xbf16, #tpu.memory_space<vmem>>, vector<128x128xbf16>
    %cst_79 = arith.constant dense<0.000000e+00> : vector<8x128xf32>
    %103 = tpu.matmul %101, %102, %cst_79 {dimension_numbers = #tpu.dot_dimension_numbers<[1], [0], [0], [1], [0, 0, 1, 1], [], []>} : vector<8x128xbf16>, vector<128x128xbf16>, vector<8x128xf32> -> vector<8x128xf32>
    %104 = arith.addf %100, %103 : vector<8x128xf32>
    %105 = math.tanh %104 : vector<8x128xf32>
    %106 = arith.truncf %105 : vector<8x128xf32> to vector<8x128xbf16>
    %c0_80 = arith.constant 0 : index
    %c0_81 = arith.constant 0 : index
    %107 = vector.load %arg5[%c0_80, %c0_81] : memref<128x128xbf16, #tpu.memory_space<vmem>>, vector<128x128xbf16>
    %cst_82 = arith.constant dense<0.000000e+00> : vector<8x128xf32>
    %108 = tpu.matmul %106, %107, %cst_82 {dimension_numbers = #tpu.dot_dimension_numbers<[1], [0], [0], [1], [0, 0, 1, 1], [], []>} : vector<8x128xbf16>, vector<128x128xbf16>, vector<8x128xf32> -> vector<8x128xf32>
    %109 = arith.addf %108, %98 : vector<8x128xf32>
    %110 = arith.addf %109, %11 : vector<8x128xf32>
    %111 = math.tanh %110 : vector<8x128xf32>
    %112 = arith.truncf %111 : vector<8x128xf32> to vector<8x128xbf16>
    %c0_83 = arith.constant 0 : index
    %c0_84 = arith.constant 0 : index
    %113 = vector.load %arg6[%c0_83, %c0_84] : memref<128x128xbf16, #tpu.memory_space<vmem>>, vector<128x128xbf16>
    %cst_85 = arith.constant dense<0.000000e+00> : vector<8x128xf32>
    %114 = tpu.matmul %112, %113, %cst_85 {dimension_numbers = #tpu.dot_dimension_numbers<[1], [0], [0], [1], [0, 0, 1, 1], [], []>} : vector<8x128xbf16>, vector<128x128xbf16>, vector<8x128xf32> -> vector<8x128xf32>
    %c6 = arith.constant 6 : index
    %c0_86 = arith.constant 0 : index
    %c0_87 = arith.constant 0 : index
    %115 = vector.load %arg11[%c6, %c0_86, %c0_87] : memref<8x8x128xf32, #tpu.memory_space<vmem>>, vector<1x8x128xf32>
    %116 = vector.shape_cast %115 : vector<1x8x128xf32> to vector<8x128xf32>
    %117 = arith.truncf %105 : vector<8x128xf32> to vector<8x128xbf16>
    %c0_88 = arith.constant 0 : index
    %c0_89 = arith.constant 0 : index
    %118 = vector.load %arg3[%c0_88, %c0_89] : memref<128x128xbf16, #tpu.memory_space<vmem>>, vector<128x128xbf16>
    %cst_90 = arith.constant dense<0.000000e+00> : vector<8x128xf32>
    %119 = tpu.matmul %117, %118, %cst_90 {dimension_numbers = #tpu.dot_dimension_numbers<[1], [0], [0], [1], [0, 0, 1, 1], [], []>} : vector<8x128xbf16>, vector<128x128xbf16>, vector<8x128xf32> -> vector<8x128xf32>
    %120 = arith.addf %116, %119 : vector<8x128xf32>
    %121 = math.tanh %120 : vector<8x128xf32>
    %122 = arith.truncf %121 : vector<8x128xf32> to vector<8x128xbf16>
    %c0_91 = arith.constant 0 : index
    %c0_92 = arith.constant 0 : index
    %123 = vector.load %arg5[%c0_91, %c0_92] : memref<128x128xbf16, #tpu.memory_space<vmem>>, vector<128x128xbf16>
    %cst_93 = arith.constant dense<0.000000e+00> : vector<8x128xf32>
    %124 = tpu.matmul %122, %123, %cst_93 {dimension_numbers = #tpu.dot_dimension_numbers<[1], [0], [0], [1], [0, 0, 1, 1], [], []>} : vector<8x128xbf16>, vector<128x128xbf16>, vector<8x128xf32> -> vector<8x128xf32>
    %125 = arith.addf %124, %114 : vector<8x128xf32>
    %126 = arith.addf %125, %11 : vector<8x128xf32>
    %127 = math.tanh %126 : vector<8x128xf32>
    %128 = arith.truncf %127 : vector<8x128xf32> to vector<8x128xbf16>
    %c0_94 = arith.constant 0 : index
    %c0_95 = arith.constant 0 : index
    %129 = vector.load %arg6[%c0_94, %c0_95] : memref<128x128xbf16, #tpu.memory_space<vmem>>, vector<128x128xbf16>
    %cst_96 = arith.constant dense<0.000000e+00> : vector<8x128xf32>
    %130 = tpu.matmul %128, %129, %cst_96 {dimension_numbers = #tpu.dot_dimension_numbers<[1], [0], [0], [1], [0, 0, 1, 1], [], []>} : vector<8x128xbf16>, vector<128x128xbf16>, vector<8x128xf32> -> vector<8x128xf32>
    %c7 = arith.constant 7 : index
    %c0_97 = arith.constant 0 : index
    %c0_98 = arith.constant 0 : index
    %131 = vector.load %arg11[%c7, %c0_97, %c0_98] : memref<8x8x128xf32, #tpu.memory_space<vmem>>, vector<1x8x128xf32>
    %132 = vector.shape_cast %131 : vector<1x8x128xf32> to vector<8x128xf32>
    %133 = arith.truncf %121 : vector<8x128xf32> to vector<8x128xbf16>
    %c0_99 = arith.constant 0 : index
    %c0_100 = arith.constant 0 : index
    %134 = vector.load %arg3[%c0_99, %c0_100] : memref<128x128xbf16, #tpu.memory_space<vmem>>, vector<128x128xbf16>
    %cst_101 = arith.constant dense<0.000000e+00> : vector<8x128xf32>
    %135 = tpu.matmul %133, %134, %cst_101 {dimension_numbers = #tpu.dot_dimension_numbers<[1], [0], [0], [1], [0, 0, 1, 1], [], []>} : vector<8x128xbf16>, vector<128x128xbf16>, vector<8x128xf32> -> vector<8x128xf32>
    %136 = arith.addf %132, %135 : vector<8x128xf32>
    %137 = math.tanh %136 : vector<8x128xf32>
    %138 = arith.truncf %137 : vector<8x128xf32> to vector<8x128xbf16>
    %c0_102 = arith.constant 0 : index
    %c0_103 = arith.constant 0 : index
    %139 = vector.load %arg5[%c0_102, %c0_103] : memref<128x128xbf16, #tpu.memory_space<vmem>>, vector<128x128xbf16>
    %cst_104 = arith.constant dense<0.000000e+00> : vector<8x128xf32>
    %140 = tpu.matmul %138, %139, %cst_104 {dimension_numbers = #tpu.dot_dimension_numbers<[1], [0], [0], [1], [0, 0, 1, 1], [], []>} : vector<8x128xbf16>, vector<128x128xbf16>, vector<8x128xf32> -> vector<8x128xf32>
    %141 = arith.addf %140, %130 : vector<8x128xf32>
    %142 = arith.addf %141, %11 : vector<8x128xf32>
    %143 = math.tanh %142 : vector<8x128xf32>
    %144 = arith.truncf %143 : vector<8x128xf32> to vector<8x128xbf16>
    %c0_105 = arith.constant 0 : index
    %c0_106 = arith.constant 0 : index
    %145 = vector.load %arg8[%c0_105, %c0_106] : memref<128x5xbf16, #tpu.memory_space<vmem>>, vector<128x5xbf16>
    %cst_107 = arith.constant dense<0.000000e+00> : vector<8x5xf32>
    %146 = tpu.matmul %144, %145, %cst_107 {dimension_numbers = #tpu.dot_dimension_numbers<[1], [0], [0], [1], [0, 0, 1, 1], [], []>} : vector<8x128xbf16>, vector<128x5xbf16>, vector<8x5xf32> -> vector<8x5xf32>
    %c0_108 = arith.constant 0 : index
    %c0_109 = arith.constant 0 : index
    %147 = vector.load %arg9[%c0_108, %c0_109] : memref<1x5xf32, #tpu.memory_space<vmem>>, vector<1x5xf32>
    %148 = vector.broadcast %147 : vector<1x5xf32> to vector<8x5xf32>
    %149 = arith.addf %146, %148 : vector<8x5xf32>
    %cst_110 = arith.constant dense<0xFF800000> : vector<8xf32>
    %150 = vector.multi_reduction <maximumf>, %149, %cst_110 [1] : vector<8x5xf32> to vector<8xf32>
    %151 = vector.shape_cast %150 : vector<8xf32> to vector<8x1xf32>
    %152 = vector.broadcast %151 : vector<8x1xf32> to vector<8x5xf32>
    %153 = arith.subf %149, %152 : vector<8x5xf32>
    %154 = math.exp %153 : vector<8x5xf32>
    %cst_111 = arith.constant dense<0.000000e+00> : vector<8xf32>
    %155 = vector.multi_reduction <add>, %154, %cst_111 [1] : vector<8x5xf32> to vector<8xf32>
    %156 = vector.shape_cast %155 : vector<8xf32> to vector<8x1xf32>
    %157 = vector.broadcast %156 : vector<8x1xf32> to vector<8x5xf32>
    %158 = arith.divf %154, %157 : vector<8x5xf32>
    %c0_112 = arith.constant 0 : index
    %c0_113 = arith.constant 0 : index
    %159 = vector.load %arg10[%c0_112, %c0_113] : memref<8x5xf32, #tpu.memory_space<vmem>>, vector<8x5xf32>
    tpu.vector_store %arg10[%c0_112, %c0_113], %158 {strides = array<i32>} : memref<8x5xf32, #tpu.memory_space<vmem>>, vector<8x5xf32>,
    return
  }
}

</mosaic_0001>

<bundles_post_ra>
// kernel: tpu_custom_call.1
= control target key start
LH: loop header
LB: loop body
LE: loop exit
PB: predicated region body
PF: predicated region fallthrough
CT: control target
= control target key end

     0   :  { %15 = vsyncpa [#allocation4], 0  ;;  %s3227_s0 = inlined_call_operand.vmem [shape: f32[64,16], index: 0, kind: input, shape index: {}]   ;;  %s3228_s1 = inlined_call_operand.vmem [shape: f32[2,8,128], index: 1, kind: input, shape index: {}]   ;;  %s3229_s2 = inlined_call_operand.vmem [shape: bf16[16,128], index: 2, kind: input, shape index: {}]   ;;  %s3230_s3 = inlined_call_operand.vmem [shape: bf16[128,128], index: 3, kind: input, shape index: {}]   ;;  %s3231_s4 = inlined_call_operand.vmem [shape: f32[1,128], index: 4, kind: input, shape index: {}]   ;;  %s3232_s5 = inlined_call_operand.vmem [shape: bf16[128,128], index: 5, kind: input, shape index: {}]   ;;  %s3233_s6 = inlined_call_operand.hbm [shape: bf16[128,128], index: 6, kind: input, shape index: {}]   ;;  %s3234_s7 = inlined_call_operand.vmem [shape: f32[1,128], index: 7, kind: input, shape index: {}]   ;;  %s3235_s8 = inlined_call_operand.vmem [shape: bf16[128,5], index: 8, kind: input, shape index: {}]   ;;  %s3236_s9 = inlined_call_operand.vmem [shape: f32[1,5], index: 9, kind: input, shape index: {}]   ;;  %s3237_s10 = inlined_call_operand.hbm [shape: f32[8,5], index: 10, kind: output, shape index: {}]  }
   0x1   :  { %16 = vsyncpa [#allocation5], 0  ;;  %s2455_s13 = smov [#allocation3]   ;;  %s2407_s17 = scalar_lea.hbm %s3233_s6, 1024 }
   0x2   :  { %s34_s14 = sshll.u32 %s2455_s13, 4  ;;  %p2408_p0 = scmp.ne.s32.totalorder %s3233_s6, %s2407_s17  ;;  %s35_s14 = int_to_ptr.vmem [resolvable:$true] %s34_s14 }
   0x3   :  { %p2411_p1 = scmp.lt.u32.totalorder %s2407_s17, %s3233_s6 }
   0x5   :  { %p2413_p2 = pnand %p2411_p1, %p2408_p0 }
   0x7   :  { %2416 = shalt.err (!%p2413_p2)
}
   0x8   :  { %s2417_s22 = scalar_lea.vmem %s35_s14, 1024  ;;  %p2422_p4 = scmp.lt.s32.totalorder %s35_s14, %s35_s14 }
   0x9   :  { %p2418_p3 = scmp.ne.s32.totalorder %s35_s14, %s2417_s22  ;;  %p2423_p5 = scmp.lt.s32.totalorder %s2417_s22, %s2417_s22 }
   0xb   :  { %p2424_p6 = por %p2423_p5, %p2422_p4 }
   0xd   :  { %p2425_p7 = pnand %p2424_p6, %p2418_p3 }
   0xf   :  { %2428 = shalt.err (!%p2425_p7)
}
  0x10   :  { %s2456_s23 = smov 64   ;;  %s2457_s24 = smov 4  }
  0x11   :  { %40 = dma.hbm_to_vmem [thread:$0]  %s3233_s6, 1024, %s35_s14, [#allocation4], %s2456_s23, %s2456_s23, %s2457_s24  }
  0x12   :  { %2451 = dma.done.wait [#allocation4], 1024  }
  0x13   :  { %2452 = vsyncadd [#allocation4], 4294966272  ;;  %v2458_v0 = vmov 0.0   ;;  %vm2459_vm0 = vmmov 0   ;;  %v2317_v1 = vld [vmem:[%s3229_s2] sm:$0xff]   ;;  %v52_v3 = vld [vmem:[%s3227_s0 + $0x8] sm:$0xff] }
  0x14   :  { %1811 = vmatprep.subr.bf16.mxu1 %v2458_v0  ;;  %1827 = vmatprep.mubr.msk.bf16.mxu1 %vm2459_vm0, %v2458_v0  ;;  %v51_v2 = vld [vmem:[%s3227_s0] sm:$0xff]  ;;  %vm78_vm1 = vcmask 130048   ;;  %v53_v4 = vld [vmem:[%s3227_s0 + $0x10] sm:$0xff]  ;;  %v54_v6 = vld [vmem:[%s3227_s0 + $0x18] sm:$0xff]  ;;  %vm1502_vm2 = vcmask 39936  }
  0x15   :  { %1801 = vmatprep.subr.bf16.mxu0 %v2317_v1  ;;  %v59_v5 = vpack.c.bf16 %v52_v3, %v51_v2  ;;  %v60_v7 = vpack.c.bf16 %v54_v6, %v53_v4  ;;  %v2549_v8 = vld [vmem:[%s3230_s3] sm:$0xff]   ;;  %v2558_v9 = vld [vmem:[%s3230_s3 + $0x8] sm:$0xff]   ;;  %v57_v13 = vld [vmem:[%s3227_s0 + $0x30] sm:$0xff] }
  0x16   :  { %1802 = vmatpush3.bf16.msra.mxu0 %v2317_v1  ;;  %v55_v10 = vld [vmem:[%s3227_s0 + $0x20] sm:$0xff]  ;;  %v56_v11 = vld [vmem:[%s3227_s0 + $0x28] sm:$0xff]  ;;  %v58_v14 = vld [vmem:[%s3227_s0 + $0x38] sm:$0xff] }
  0x17   :  { %1803 = vmatprep.mubr.msk.bf16.mxu0 %vm78_vm1, %v59_v5  ;;  %1831 = vmatprep.subr.bf16.mxu0 %v2458_v0  ;;  %v61_v12 = vpack.c.bf16 %v56_v11, %v55_v10  ;;  %v62_v15 = vpack.c.bf16 %v58_v14, %v57_v13  ;;  %v2578_v16 = vld [vmem:[%s3230_s3 + $0x10] sm:$0xff]   ;;  %v2581_v17 = vld [vmem:[#allocation3] sm:$0xff]   ;;  %v2585_v18 = vld [vmem:[#allocation3 + $0x8] sm:$0xff]  }
  0x18   :  { %1812 = vmatpush3.bf16.msra.mxu1 %v2581_v17  ;;  %v2591_v19 = vld [vmem:[%s3230_s3 + $0x18] sm:$0xff]   ;;  %v2597_v20 = vld [vmem:[#allocation3 + $0x10] sm:$0xff]   ;;  %v2602_v21 = vld [vmem:[%s3230_s3 + $0x20] sm:$0xff]  }
  0x19   :  { %1804 = vmatmul.mubr.msk.bf16.vlgmr.msra.gmra.mrb[0].mxu0 %vm78_vm1, %v60_v7  ;;  %1813 = vmatprep.subr.bf16.mxu1 %v2458_v0  ;;  %v2608_v22 = vld [vmem:[#allocation3 + $0x18] sm:$0xff]   ;;  %v2613_v23 = vld [vmem:[%s3230_s3 + $0x28] sm:$0xff]   ;;  %v2619_v24 = vld [vmem:[#allocation3 + $0x20] sm:$0xff]  }
  0x1a   :  { %1832 = vmatpush3.bf16.msra.mxu0 %v2549_v8  ;;  %1807 = vmatprep.mubr.msk.bf16.mxu0 %vm78_vm1, %v61_v12  ;;  %v2624_v25 = vld [vmem:[%s3230_s3 + $0x30] sm:$0xff]   ;;  %v2635_v26 = vld [vmem:[%s3230_s3 + $0x38] sm:$0xff]   ;;  %v171_v27 = vld [vmem:[%s3228_s1] sm:$0xff] }
  0x1b   :  { %1833 = vmatprep.subr.bf16.mxu0 %v2458_v0  ;;  %v280_v28 = vpack.c.bf16 %v171_v27, %v171_v27  ;;  %v2656_v29 = vld [vmem:[#allocation3 + $0x28] sm:$0xff]   ;;  %v2661_v30 = vld [vmem:[#allocation3 + $0x30] sm:$0xff]   ;;  %v2665_v31 = vld [vmem:[#allocation3 + $0x38] sm:$0xff]  }
  0x1c   :  { %1814 = vmatpush3.bf16.msra.mxu1 %v2585_v18  ;;  %v1537_v32 = vld [vmem:[%s3228_s1 + $0x8] sm:$0xff]  ;;  %v2677_v34 = vld [vmem:[%s3232_s5] sm:$0xff]   ;;  %v2695_v36 = vld [vmem:[%s3232_s5 + $0x10] sm:$0xff]  }
  0x1d   :  { %1815 = vmatprep.subr.bf16.mxu1 %v2458_v0  ;;  %v174_v33 = vpack.c.bf16 %v1537_v32, %v1537_v32  ;;  %v2686_v35 = vld [vmem:[%s3232_s5 + $0x8] sm:$0xff]   ;;  %v2702_v37 = vld [vmem:[%s3232_s5 + $0x18] sm:$0xff]   ;;  %v2710_v38 = vld [vmem:[%s3232_s5 + $0x20] sm:$0xff]  }
  0x1e   :  { %1834 = vmatpush3.bf16.msra.mxu0 %v2558_v9  ;;  %v2717_v39 = vld [vmem:[%s3232_s5 + $0x28] sm:$0xff]   ;;  %v2724_v40 = vld [vmem:[%s3232_s5 + $0x30] sm:$0xff]   ;;  %v2731_v41 = vld [vmem:[%s3232_s5 + $0x38] sm:$0xff]  }
  0x1f   :  { %1835 = vmatprep.subr.bf16.mxu0 %v2458_v0  ;;  %v1530_v42 = vld [vmem:[%s3231_s4] ss:$0 sm:$0xff] }
  0x20   :  { %1816 = vmatpush3.bf16.msra.mxu1 %v2597_v20  ;;  %v2791_v7 = vld [vmem:[%s3234_s7] ss:$0 sm:$0xff] }
  0x21   :  { %1808 = vmatmul.mubr.msk.bf16.gmra.mrb[4].mxu0 %vm78_vm1, %v62_v15  ;;  %1817 = vmatprep.subr.bf16.mxu1 %v2458_v0 }
  0x22   :  { %1836 = vmatpush3.bf16.msra.mxu0 %v2578_v16  ;;  %1847 = vmatprep.mubr.msk.bf16.mxu0 %vm2459_vm0, %v2458_v0 }
  0x23   :  { %1837 = vmatprep.subr.bf16.mxu0 %v2458_v0 }
  0x24   :  { %1818 = vmatpush3.bf16.msra.mxu1 %v2608_v22 }
  0x25   :  { %1819 = vmatprep.subr.bf16.mxu1 %v2458_v0 }
  0x26   :  { %1838 = vmatpush3.bf16.msra.mxu0 %v2591_v19 }
  0x27   :  { %1839 = vmatprep.subr.bf16.mxu0 %v2458_v0 }
  0x28   :  { %1820 = vmatpush3.bf16.msra.mxu1 %v2619_v24 }
  0x29   :  { %1821 = vmatprep.subr.bf16.mxu1 %v2458_v0 }
  0x2a   :  { %1840 = vmatpush3.bf16.msra.mxu0 %v2602_v21 }
  0x2b   :  { %1841 = vmatprep.subr.bf16.mxu0 %v2458_v0 }
  0x2c   :  { %1822 = vmatpush3.bf16.msra.mxu1 %v2656_v29 }
  0x2d   :  { %1823 = vmatprep.subr.bf16.mxu1 %v2458_v0 }
  0x2e   :  { %1842 = vmatpush3.bf16.msra.mxu0 %v2613_v23 }
  0x2f   :  { %1843 = vmatprep.subr.bf16.mxu0 %v2458_v0 }
  0x30   :  { %1824 = vmatpush3.bf16.msra.mxu1 %v2661_v30 }
  0x31   :  { %1825 = vmatprep.subr.bf16.mxu1 %v2458_v0 }
  0x32   :  { %1844 = vmatpush3.bf16.msra.mxu0 %v2624_v25 }
  0x33   :  { %1845 = vmatprep.subr.bf16.mxu0 %v2458_v0 }
  0x34   :  { %1826 = vmatpush3.bf16.msra.mxu1 %v2665_v31 }
  0x35   :  { %1851 = vmatprep.subr.bf16.mxu1 %v2458_v0 }
  0x36   :  { %1846 = vmatpush3.bf16.msra.mxu0 %v2635_v26 }
  0x37   :  { %1871 = vmatprep.subr.bf16.mxu0 %v2458_v0  ;;  %1828 = vmatmul.mubr.bf16.vlgmr.msra.gmra.mrb[0].mxu1 %v174_v33 }
  0x38   :  { %1852 = vmatpush3.bf16.msra.mxu1 %v2677_v34  ;;  %1867 = vmatprep.mubr.msk.bf16.mxu1 %vm2459_vm0, %v2458_v0 }
  0x39   :  { %1848 = vmatmul.mubr.bf16.vlgmr.msra.gmra.mrb[8].mxu0 %v280_v28  ;;  %1853 = vmatprep.subr.bf16.mxu1 %v2458_v0 }
  0x3a   :  { %1872 = vmatpush3.bf16.msra.mxu0 %v2581_v17  ;;  %1887 = vmatprep.mubr.msk.bf16.mxu0 %vm2459_vm0, %v2458_v0 }
  0x3b   :  { %1873 = vmatprep.subr.bf16.mxu0 %v2458_v0 }
  0x3c   :  { %1854 = vmatpush3.bf16.msra.mxu1 %v2686_v35 }
  0x3d   :  { %1855 = vmatprep.subr.bf16.mxu1 %v2458_v0 }
  0x3e   :  { %1874 = vmatpush3.bf16.msra.mxu0 %v2585_v18 }
  0x3f   :  { %1875 = vmatprep.subr.bf16.mxu0 %v2458_v0 }
  0x40   :  { %1856 = vmatpush3.bf16.msra.mxu1 %v2695_v36 }
  0x41   :  { %1857 = vmatprep.subr.bf16.mxu1 %v2458_v0 }
  0x42   :  { %1876 = vmatpush3.bf16.msra.mxu0 %v2597_v20 }
  0x43   :  { %1877 = vmatprep.subr.bf16.mxu0 %v2458_v0 }
  0x44   :  { %1858 = vmatpush3.bf16.msra.mxu1 %v2702_v37 }
  0x45   :  { %1859 = vmatprep.subr.bf16.mxu1 %v2458_v0 }
  0x46   :  { %1878 = vmatpush3.bf16.msra.mxu0 %v2608_v22 }
  0x47   :  { %1879 = vmatprep.subr.bf16.mxu0 %v2458_v0 }
  0x48   :  { %1860 = vmatpush3.bf16.msra.mxu1 %v2710_v38 }
  0x49   :  { %1861 = vmatprep.subr.bf16.mxu1 %v2458_v0 }
  0x4a   :  { %1880 = vmatpush3.bf16.msra.mxu0 %v2619_v24 }
  0x4b   :  { %1881 = vmatprep.subr.bf16.mxu0 %v2458_v0 }
  0x4c   :  { %1862 = vmatpush3.bf16.msra.mxu1 %v2717_v39 }
  0x4d   :  { %1863 = vmatprep.subr.bf16.mxu1 %v2458_v0 }
  0x4e   :  { %1882 = vmatpush3.bf16.msra.mxu0 %v2656_v29 }
  0x4f   :  { %1883 = vmatprep.subr.bf16.mxu0 %v2458_v0 }
  0x50   :  { %1864 = vmatpush3.bf16.msra.mxu1 %v2724_v40 }
  0x51   :  { %1865 = vmatprep.subr.bf16.mxu1 %v2458_v0 }
  0x52   :  { %1884 = vmatpush3.bf16.msra.mxu0 %v2661_v30 }
  0x53   :  { %1885 = vmatprep.subr.bf16.mxu0 %v2458_v0 }
  0x54   :  { %1866 = vmatpush3.bf16.msra.mxu1 %v2731_v41 }
  0x55   :  { %1891 = vmatprep.subr.bf16.mxu1 %v2458_v0 }
  0x56   :  { %1886 = vmatpush3.bf16.msra.mxu0 %v2665_v31 }
  0x57   :  { %1911 = vmatprep.subr.bf16.mxu0 %v2458_v0 }
  0xec   :  { %v1805_v43 = vpop.f32.mrb[0].mxu0 }
  0xed   :  { %v2738_v44 = vadd.f32 %v1805_v43, %v1530_v42  ;;  %v125_v45 = vpop.f32.mrb[1].mxu0 }
  0xee   :  { %v1806_v46 = vpop.f32.mrb[2].mxu0  ;;  %v126_v58 = vadd.f32 %v1530_v42, %v125_v45 }
  0xef   :  { %v2740_v47 = vadd.f32 %v1806_v46, %v1530_v42  ;;  %v128_v48 = vpop.f32.mrb[3].mxu0 }
  0xf0   :  { %v2742_v49 = vadd.f32 %v1530_v42, %v128_v48 }
  0xf4   :  { %v1809_v50 = vpop.f32.mrb[4].mxu0 }
  0xf5   :  { %v2744_v51 = vadd.f32 %v1809_v50, %v1530_v42  ;;  %v141_v52 = vpop.f32.mrb[5].mxu0 }
  0xf6   :  { %v2746_v53 = vadd.f32 %v1530_v42, %v141_v52  ;;  %v1810_v54 = vpop.f32.mrb[6].mxu0 }
  0xf7   :  { %v2748_v55 = vadd.f32 %v1810_v54, %v1530_v42  ;;  %v144_v56 = vpop.f32.mrb[7].mxu0 }
  0xf8   :  { %v2750_v57 = vadd.f32 %v1530_v42, %v144_v56 }
 0x10a   :  { %v273_v3 = vpop.f32.mrb[0].mxu1 }
 0x10b   :  { %v1829_v4 = vpop.f32.mrb[1].mxu1 }
 0x10c   :  { %v379_v59 = vpop.f32.mrb[8].mxu0  ;;  %v276_v5 = vpop.f32.mrb[2].mxu1 }
 0x10d   :  { %v385_v60 = vadd.f32 %v379_v59, %v126_v58  ;;  %v1849_v61 = vpop.f32.mrb[9].mxu0  ;;  %v1830_v6 = vpop.f32.mrb[3].mxu1 }
 0x10e   :  { %v382_v62 = vpop.f32.mrb[10].mxu0 }
 0x10f   :  { %2350 = vtanh.f32 %v385_v60  ;;  %v1850_v63 = vpop.f32.mrb[11].mxu0 }
 0x119   :  { %v2351_v1 = vpop.eup %2350 }
 0x11a   :  { %v387_v2 = vpack.c.bf16 %v2351_v1, %v2351_v1 }
 0x11c   :  { %1868 = vmatmul.mubr.bf16.vlgmr.msra.gmra.mrb[4].mxu1 %v387_v2 }
 0x11d   :  { %1892 = vmatpush3.bf16.msra.mxu1 %v2549_v8  ;;  %1907 = vmatprep.mubr.msk.bf16.mxu1 %vm2459_vm0, %v2458_v0 }
 0x11e   :  { %1893 = vmatprep.subr.bf16.mxu1 %v2458_v0 }
 0x121   :  { %1894 = vmatpush3.bf16.msra.mxu1 %v2558_v9 }
 0x122   :  { %1895 = vmatprep.subr.bf16.mxu1 %v2458_v0 }
 0x125   :  { %1896 = vmatpush3.bf16.msra.mxu1 %v2578_v16 }
 0x126   :  { %1897 = vmatprep.subr.bf16.mxu1 %v2458_v0 }
 0x129   :  { %1898 = vmatpush3.bf16.msra.mxu1 %v2591_v19 }
 0x12a   :  { %1899 = vmatprep.subr.bf16.mxu1 %v2458_v0 }
 0x12d   :  { %1900 = vmatpush3.bf16.msra.mxu1 %v2602_v21 }
 0x12e   :  { %1901 = vmatprep.subr.bf16.mxu1 %v2458_v0 }
 0x131   :  { %1902 = vmatpush3.bf16.msra.mxu1 %v2613_v23 }
 0x132   :  { %1903 = vmatprep.subr.bf16.mxu1 %v2458_v0 }
 0x135   :  { %1904 = vmatpush3.bf16.msra.mxu1 %v2624_v25 }
 0x136   :  { %1905 = vmatprep.subr.bf16.mxu1 %v2458_v0 }
 0x139   :  { %1906 = vmatpush3.bf16.msra.mxu1 %v2635_v26 }
 0x13a   :  { %1931 = vmatprep.subr.bf16.mxu1 %v2458_v0 }
 0x13c   :  { %1908 = vmatmul.mubr.bf16.vlgmr.msra.gmra.mrb[8].mxu1 %v387_v2 }
 0x13d   :  { %1932 = vmatpush3.bf16.msra.mxu1 %v2581_v17  ;;  %1947 = vmatprep.mubr.msk.bf16.mxu1 %vm2459_vm0, %v2458_v0 }
 0x13e   :  { %1933 = vmatprep.subr.bf16.mxu1 %v2458_v0 }
 0x141   :  { %1934 = vmatpush3.bf16.msra.mxu1 %v2585_v18 }
 0x142   :  { %1935 = vmatprep.subr.bf16.mxu1 %v2458_v0 }
 0x145   :  { %1936 = vmatpush3.bf16.msra.mxu1 %v2597_v20 }
 0x146   :  { %1937 = vmatprep.subr.bf16.mxu1 %v2458_v0 }
 0x149   :  { %1938 = vmatpush3.bf16.msra.mxu1 %v2608_v22 }
 0x14a   :  { %1939 = vmatprep.subr.bf16.mxu1 %v2458_v0 }
 0x14d   :  { %1940 = vmatpush3.bf16.msra.mxu1 %v2619_v24 }
 0x14e   :  { %1941 = vmatprep.subr.bf16.mxu1 %v2458_v0 }
 0x151   :  { %1942 = vmatpush3.bf16.msra.mxu1 %v2656_v29 }
 0x152   :  { %1943 = vmatprep.subr.bf16.mxu1 %v2458_v0 }
 0x155   :  { %1944 = vmatpush3.bf16.msra.mxu1 %v2661_v30 }
 0x156   :  { %1945 = vmatprep.subr.bf16.mxu1 %v2458_v0 }
 0x159   :  { %1946 = vmatpush3.bf16.msra.mxu1 %v2665_v31 }
 0x15a   :  { %1971 = vmatprep.subr.bf16.mxu1 %v2458_v0 }
 0x1ef   :  { %v486_v10 = vpop.f32.mrb[4].mxu1 }
 0x1f0   :  { %v487_v11 = vadd.f32 %v486_v10, %v273_v3  ;;  %v1869_v12 = vpop.f32.mrb[5].mxu1 }
 0x1f1   :  { %v489_v13 = vpop.f32.mrb[6].mxu1 }
 0x1f2   :  { %v492_v14 = vadd.f32 %v2791_v7, %v487_v11  ;;  %v1870_v15 = vpop.f32.mrb[7].mxu1 }
 0x1f4   :  { %2352 = vtanh.f32 %v492_v14 }
 0x1fe   :  { %v2353_v27 = vpop.eup %2352 }
 0x1ff   :  { %v494_v28 = vpack.c.bf16 %v2353_v27, %v2353_v27 }
 0x201   :  { %1888 = vmatmul.mubr.bf16.vlgmr.msra.gmra.mrb[12].mxu0 %v494_v28 }
 0x202   :  { %1912 = vmatpush3.bf16.msra.mxu0 %v2677_v34  ;;  %1927 = vmatprep.mubr.msk.bf16.mxu0 %vm2459_vm0, %v2458_v0 }
 0x203   :  { %1913 = vmatprep.subr.bf16.mxu0 %v2458_v0 }
 0x206   :  { %1914 = vmatpush3.bf16.msra.mxu0 %v2686_v35 }
 0x207   :  { %1915 = vmatprep.subr.bf16.mxu0 %v2458_v0 }
 0x20a   :  { %1916 = vmatpush3.bf16.msra.mxu0 %v2695_v36 }
 0x20b   :  { %1917 = vmatprep.subr.bf16.mxu0 %v2458_v0 }
 0x20e   :  { %1918 = vmatpush3.bf16.msra.mxu0 %v2702_v37 }
 0x20f   :  { %v571_v32 = vpop.f32.mrb[8].mxu1  ;;  %1919 = vmatprep.subr.bf16.mxu0 %v2458_v0 }
 0x210   :  { %v577_v33 = vadd.f32 %v571_v32, %v2742_v49  ;;  %v1909_v42 = vpop.f32.mrb[9].mxu1 }
 0x211   :  { %v574_v43 = vpop.f32.mrb[10].mxu1 }
 0x212   :  { %2354 = vtanh.f32 %v577_v33  ;;  %v1910_v45 = vpop.f32.mrb[11].mxu1  ;;  %1920 = vmatpush3.bf16.msra.mxu0 %v2710_v38 }
 0x213   :  { %1921 = vmatprep.subr.bf16.mxu0 %v2458_v0 }
 0x216   :  { %1922 = vmatpush3.bf16.msra.mxu0 %v2717_v39 }
 0x217   :  { %1923 = vmatprep.subr.bf16.mxu0 %v2458_v0 }
 0x21a   :  { %1924 = vmatpush3.bf16.msra.mxu0 %v2724_v40 }
 0x21b   :  { %1925 = vmatprep.subr.bf16.mxu0 %v2458_v0 }
 0x21c   :  { %v2355_v46 = vpop.eup %2354 }
 0x21d   :  { %v579_v48 = vpack.c.bf16 %v2355_v46, %v2355_v46 }
 0x21e   :  { %1926 = vmatpush3.bf16.msra.mxu0 %v2731_v41 }
 0x21f   :  { %1951 = vmatprep.subr.bf16.mxu0 %v2458_v0 }
 0x221   :  { %1928 = vmatmul.mubr.bf16.vlgmr.msra.gmra.mrb[16].mxu0 %v579_v48 }
 0x222   :  { %1952 = vmatpush3.bf16.msra.mxu0 %v2549_v8  ;;  %1967 = vmatprep.mubr.msk.bf16.mxu0 %vm2459_vm0, %v2458_v0 }
 0x223   :  { %1953 = vmatprep.subr.bf16.mxu0 %v2458_v0 }
 0x226   :  { %1954 = vmatpush3.bf16.msra.mxu0 %v2558_v9 }
 0x227   :  { %1955 = vmatprep.subr.bf16.mxu0 %v2458_v0 }
 0x22a   :  { %1956 = vmatpush3.bf16.msra.mxu0 %v2578_v16 }
 0x22b   :  { %1957 = vmatprep.subr.bf16.mxu0 %v2458_v0 }
 0x22e   :  { %1958 = vmatpush3.bf16.msra.mxu0 %v2591_v19 }
 0x22f   :  { %1959 = vmatprep.subr.bf16.mxu0 %v2458_v0 }
 0x232   :  { %1960 = vmatpush3.bf16.msra.mxu0 %v2602_v21 }
 0x233   :  { %1961 = vmatprep.subr.bf16.mxu0 %v2458_v0 }
 0x236   :  { %1962 = vmatpush3.bf16.msra.mxu0 %v2613_v23 }
 0x237   :  { %1963 = vmatprep.subr.bf16.mxu0 %v2458_v0 }
 0x23a   :  { %1964 = vmatpush3.bf16.msra.mxu0 %v2624_v25 }
 0x23b   :  { %1965 = vmatprep.subr.bf16.mxu0 %v2458_v0 }
 0x23e   :  { %1966 = vmatpush3.bf16.msra.mxu0 %v2635_v26 }
 0x23f   :  { %1991 = vmatprep.subr.bf16.mxu0 %v2458_v0 }
 0x241   :  { %1968 = vmatmul.mubr.bf16.vlgmr.msra.gmra.mrb[20].mxu0 %v579_v48 }
 0x242   :  { %1992 = vmatpush3.bf16.msra.mxu0 %v2581_v17  ;;  %2007 = vmatprep.mubr.msk.bf16.mxu0 %vm2459_vm0, %v2458_v0 }
 0x243   :  { %1993 = vmatprep.subr.bf16.mxu0 %v2458_v0 }
 0x246   :  { %1994 = vmatpush3.bf16.msra.mxu0 %v2585_v18 }
 0x247   :  { %1995 = vmatprep.subr.bf16.mxu0 %v2458_v0 }
 0x24a   :  { %1996 = vmatpush3.bf16.msra.mxu0 %v2597_v20 }
 0x24b   :  { %1997 = vmatprep.subr.bf16.mxu0 %v2458_v0 }
 0x24e   :  { %1998 = vmatpush3.bf16.msra.mxu0 %v2608_v22 }
 0x24f   :  { %1999 = vmatprep.subr.bf16.mxu0 %v2458_v0 }
 0x252   :  { %2000 = vmatpush3.bf16.msra.mxu0 %v2619_v24 }
 0x253   :  { %2001 = vmatprep.subr.bf16.mxu0 %v2458_v0 }
 0x256   :  { %2002 = vmatpush3.bf16.msra.mxu0 %v2656_v29 }
 0x257   :  { %2003 = vmatprep.subr.bf16.mxu0 %v2458_v0 }
 0x25a   :  { %2004 = vmatpush3.bf16.msra.mxu0 %v2661_v30 }
 0x25b   :  { %2005 = vmatprep.subr.bf16.mxu0 %v2458_v0 }
 0x25e   :  { %2006 = vmatpush3.bf16.msra.mxu0 %v2665_v31 }
 0x25f   :  { %2031 = vmatprep.subr.bf16.mxu0 %v2458_v0 }
 0x2d4   :  { %v529_v49 = vpop.f32.mrb[12].mxu0 }
 0x2d5   :  { %v1889_v50 = vpop.f32.mrb[13].mxu0 }
 0x2d6   :  { %v532_v52 = vpop.f32.mrb[14].mxu0 }
 0x2d7   :  { %v1890_v54 = vpop.f32.mrb[15].mxu0 }
 0x2f4   :  { %v614_v56 = vpop.f32.mrb[16].mxu0 }
 0x2f5   :  { %v615_v58 = vadd.f32 %v614_v56, %v529_v49  ;;  %v1929_v59 = vpop.f32.mrb[17].mxu0 }
 0x2f6   :  { %v617_v60 = vpop.f32.mrb[18].mxu0 }
 0x2f7   :  { %v620_v61 = vadd.f32 %v2791_v7, %v615_v58  ;;  %v1930_v62 = vpop.f32.mrb[19].mxu0 }
 0x2f9   :  { %2356 = vtanh.f32 %v620_v61 }
 0x303   :  { %v2357_v63 = vpop.eup %2356 }
 0x304   :  { %v622_v1 = vpack.c.bf16 %v2357_v63, %v2357_v63 }
 0x306   :  { %1948 = vmatmul.mubr.bf16.vlgmr.msra.gmra.mrb[12].mxu1 %v622_v1 }
 0x307   :  { %1972 = vmatpush3.bf16.msra.mxu1 %v2677_v34  ;;  %1987 = vmatprep.mubr.msk.bf16.mxu1 %vm2459_vm0, %v2458_v0 }
 0x308   :  { %1973 = vmatprep.subr.bf16.mxu1 %v2458_v0 }
 0x30b   :  { %1974 = vmatpush3.bf16.msra.mxu1 %v2686_v35 }
 0x30c   :  { %1975 = vmatprep.subr.bf16.mxu1 %v2458_v0 }
 0x30f   :  { %1976 = vmatpush3.bf16.msra.mxu1 %v2695_v36 }
 0x310   :  { %1977 = vmatprep.subr.bf16.mxu1 %v2458_v0 }
 0x313   :  { %1978 = vmatpush3.bf16.msra.mxu1 %v2702_v37 }
 0x314   :  { %v699_v2 = vpop.f32.mrb[20].mxu0  ;;  %1979 = vmatprep.subr.bf16.mxu1 %v2458_v0 }
 0x315   :  { %v705_v3 = vadd.f32 %v699_v2, %v2738_v44  ;;  %v1969_v4 = vpop.f32.mrb[21].mxu0 }
 0x316   :  { %v702_v5 = vpop.f32.mrb[22].mxu0 }
 0x317   :  { %2358 = vtanh.f32 %v705_v3  ;;  %1980 = vmatpush3.bf16.msra.mxu1 %v2710_v38  ;;  %v1970_v6 = vpop.f32.mrb[23].mxu0 }
 0x318   :  { %1981 = vmatprep.subr.bf16.mxu1 %v2458_v0 }
 0x31b   :  { %1982 = vmatpush3.bf16.msra.mxu1 %v2717_v39 }
 0x31c   :  { %1983 = vmatprep.subr.bf16.mxu1 %v2458_v0 }
 0x31f   :  { %1984 = vmatpush3.bf16.msra.mxu1 %v2724_v40 }
 0x320   :  { %1985 = vmatprep.subr.bf16.mxu1 %v2458_v0 }
 0x321   :  { %v2359_v10 = vpop.eup %2358 }
 0x322   :  { %v707_v11 = vpack.c.bf16 %v2359_v10, %v2359_v10 }
 0x323   :  { %1986 = vmatpush3.bf16.msra.mxu1 %v2731_v41 }
 0x324   :  { %2011 = vmatprep.subr.bf16.mxu1 %v2458_v0 }
 0x326   :  { %1988 = vmatmul.mubr.bf16.vlgmr.msra.gmra.mrb[16].mxu1 %v707_v11 }
 0x327   :  { %2012 = vmatpush3.bf16.msra.mxu1 %v2549_v8  ;;  %2027 = vmatprep.mubr.msk.bf16.mxu1 %vm2459_vm0, %v2458_v0 }
 0x328   :  { %2013 = vmatprep.subr.bf16.mxu1 %v2458_v0 }
 0x32b   :  { %2014 = vmatpush3.bf16.msra.mxu1 %v2558_v9 }
 0x32c   :  { %2015 = vmatprep.subr.bf16.mxu1 %v2458_v0 }
 0x32f   :  { %2016 = vmatpush3.bf16.msra.mxu1 %v2578_v16 }
 0x330   :  { %2017 = vmatprep.subr.bf16.mxu1 %v2458_v0 }
 0x333   :  { %2018 = vmatpush3.bf16.msra.mxu1 %v2591_v19 }
 0x334   :  { %2019 = vmatprep.subr.bf16.mxu1 %v2458_v0 }
 0x337   :  { %2020 = vmatpush3.bf16.msra.mxu1 %v2602_v21 }
 0x338   :  { %2021 = vmatprep.subr.bf16.mxu1 %v2458_v0 }
 0x33b   :  { %2022 = vmatpush3.bf16.msra.mxu1 %v2613_v23 }
 0x33c   :  { %2023 = vmatprep.subr.bf16.mxu1 %v2458_v0 }
 0x33f   :  { %2024 = vmatpush3.bf16.msra.mxu1 %v2624_v25 }
 0x340   :  { %2025 = vmatprep.subr.bf16.mxu1 %v2458_v0 }
 0x343   :  { %2026 = vmatpush3.bf16.msra.mxu1 %v2635_v26 }
 0x344   :  { %2051 = vmatprep.subr.bf16.mxu1 %v2458_v0 }
 0x346   :  { %2028 = vmatmul.mubr.bf16.vlgmr.msra.gmra.mrb[20].mxu1 %v707_v11 }
 0x347   :  { %2052 = vmatpush3.bf16.msra.mxu1 %v2581_v17  ;;  %2067 = vmatprep.mubr.msk.bf16.mxu1 %vm2459_vm0, %v2458_v0 }
 0x348   :  { %2053 = vmatprep.subr.bf16.mxu1 %v2458_v0 }
 0x34b   :  { %2054 = vmatpush3.bf16.msra.mxu1 %v2585_v18 }
 0x34c   :  { %2055 = vmatprep.subr.bf16.mxu1 %v2458_v0 }
 0x34f   :  { %2056 = vmatpush3.bf16.msra.mxu1 %v2597_v20 }
 0x350   :  { %2057 = vmatprep.subr.bf16.mxu1 %v2458_v0 }
 0x353   :  { %2058 = vmatpush3.bf16.msra.mxu1 %v2608_v22 }
 0x354   :  { %2059 = vmatprep.subr.bf16.mxu1 %v2458_v0 }
 0x357   :  { %2060 = vmatpush3.bf16.msra.mxu1 %v2619_v24 }
 0x358   :  { %2061 = vmatprep.subr.bf16.mxu1 %v2458_v0 }
 0x35b   :  { %2062 = vmatpush3.bf16.msra.mxu1 %v2656_v29 }
 0x35c   :  { %2063 = vmatprep.subr.bf16.mxu1 %v2458_v0 }
 0x35f   :  { %2064 = vmatpush3.bf16.msra.mxu1 %v2661_v30 }
 0x360   :  { %2065 = vmatprep.subr.bf16.mxu1 %v2458_v0 }
 0x363   :  { %2066 = vmatpush3.bf16.msra.mxu1 %v2665_v31 }
 0x364   :  { %2091 = vmatprep.subr.bf16.mxu1 %v2458_v0 }
 0x3d9   :  { %v657_v44 = vpop.f32.mrb[12].mxu1 }
 0x3da   :  { %v1949_v12 = vpop.f32.mrb[13].mxu1 }
 0x3db   :  { %v660_v13 = vpop.f32.mrb[14].mxu1 }
 0x3dc   :  { %v1950_v14 = vpop.f32.mrb[15].mxu1 }
 0x3f9   :  { %v742_v15 = vpop.f32.mrb[16].mxu1 }
 0x3fa   :  { %v743_v27 = vadd.f32 %v742_v15, %v657_v44  ;;  %v1989_v28 = vpop.f32.mrb[17].mxu1 }
 0x3fb   :  { %v745_v32 = vpop.f32.mrb[18].mxu1 }
 0x3fc   :  { %v748_v33 = vadd.f32 %v2791_v7, %v743_v27  ;;  %v1990_v42 = vpop.f32.mrb[19].mxu1 }
 0x3fe   :  { %2360 = vtanh.f32 %v748_v33 }
 0x408   :  { %v2361_v43 = vpop.eup %2360 }
 0x409   :  { %v750_v45 = vpack.c.bf16 %v2361_v43, %v2361_v43 }
 0x40b   :  { %2008 = vmatmul.mubr.bf16.vlgmr.msra.gmra.mrb[24].mxu0 %v750_v45  ;;  %v3049_v45 = vld [vmem:[%s3230_s3 + $0x8] sm:$0xff]  }
 0x40c   :  { %2032 = vmatpush3.bf16.msra.mxu0 %v2677_v34  ;;  %2047 = vmatprep.mubr.msk.bf16.mxu0 %vm2459_vm0, %v2458_v0 }
 0x40d   :  { %2033 = vmatprep.subr.bf16.mxu0 %v2458_v0 }
 0x410   :  { %2034 = vmatpush3.bf16.msra.mxu0 %v2686_v35 }
 0x411   :  { %2035 = vmatprep.subr.bf16.mxu0 %v2458_v0 }
 0x414   :  { %2036 = vmatpush3.bf16.msra.mxu0 %v2695_v36 }
 0x415   :  { %2037 = vmatprep.subr.bf16.mxu0 %v2458_v0 }
 0x418   :  { %2038 = vmatpush3.bf16.msra.mxu0 %v2702_v37 }
 0x419   :  { %v827_v46 = vpop.f32.mrb[20].mxu1  ;;  %2039 = vmatprep.subr.bf16.mxu0 %v2458_v0 }
 0x41a   :  { %v833_v48 = vadd.f32 %v827_v46, %v2740_v47  ;;  %v2029_v49 = vpop.f32.mrb[21].mxu1  ;;  %v3056_v46 = vld [vmem:[%s3230_s3 + $0x10] sm:$0xff]  }
 0x41b   :  { %v830_v50 = vpop.f32.mrb[22].mxu1  ;;  %v3070_v49 = vld [vmem:[%s3230_s3 + $0x20] sm:$0xff]  }
 0x41c   :  { %2362 = vtanh.f32 %v833_v48  ;;  %2040 = vmatpush3.bf16.msra.mxu0 %v2710_v38  ;;  %v2030_v52 = vpop.f32.mrb[23].mxu1  ;;  %v3063_v48 = vld [vmem:[%s3230_s3 + $0x18] sm:$0xff]   ;;  %v3077_v50 = vld [vmem:[%s3230_s3 + $0x28] sm:$0xff]  }
 0x41d   :  { %2041 = vmatprep.subr.bf16.mxu0 %v2458_v0  ;;  %v2392_v52 = vld [vmem:[#allocation3] sm:$0xff]  }
 0x420   :  { %2042 = vmatpush3.bf16.msra.mxu0 %v2717_v39 }
 0x421   :  { %2043 = vmatprep.subr.bf16.mxu0 %v2458_v0 }
 0x424   :  { %2044 = vmatpush3.bf16.msra.mxu0 %v2724_v40 }
 0x425   :  { %2045 = vmatprep.subr.bf16.mxu0 %v2458_v0 }
 0x426   :  { %v2363_v54 = vpop.eup %2362 }
 0x427   :  { %v835_v56 = vpack.c.bf16 %v2363_v54, %v2363_v54  ;;  %v2393_v54 = vld [vmem:[#allocation3 + $0x8] sm:$0xff]  }
 0x428   :  { %2046 = vmatpush3.bf16.msra.mxu0 %v2731_v41 }
 0x429   :  { %2071 = vmatprep.subr.bf16.mxu0 %v2458_v0 }
 0x42b   :  { %2048 = vmatmul.mubr.bf16.vlgmr.msra.gmra.mrb[28].mxu0 %v835_v56 }
 0x42c   :  { %2072 = vmatpush3.bf16.msra.mxu0 %v2549_v8  ;;  %2087 = vmatprep.mubr.msk.bf16.mxu0 %vm2459_vm0, %v2458_v0 }
 0x42d   :  { %2073 = vmatprep.subr.bf16.mxu0 %v2458_v0 }
 0x430   :  { %2074 = vmatpush3.bf16.msra.mxu0 %v2558_v9 }
 0x431   :  { %2075 = vmatprep.subr.bf16.mxu0 %v2458_v0 }
 0x434   :  { %2076 = vmatpush3.bf16.msra.mxu0 %v2578_v16 }
 0x435   :  { %2077 = vmatprep.subr.bf16.mxu0 %v2458_v0 }
 0x438   :  { %2078 = vmatpush3.bf16.msra.mxu0 %v2591_v19 }
 0x439   :  { %2079 = vmatprep.subr.bf16.mxu0 %v2458_v0 }
 0x43c   :  { %2080 = vmatpush3.bf16.msra.mxu0 %v2602_v21 }
 0x43d   :  { %2081 = vmatprep.subr.bf16.mxu0 %v2458_v0 }
 0x440   :  { %2082 = vmatpush3.bf16.msra.mxu0 %v2613_v23 }
 0x441   :  { %2083 = vmatprep.subr.bf16.mxu0 %v2458_v0 }
 0x444   :  { %2084 = vmatpush3.bf16.msra.mxu0 %v2624_v25 }
 0x445   :  { %2085 = vmatprep.subr.bf16.mxu0 %v2458_v0 }
 0x448   :  { %2086 = vmatpush3.bf16.msra.mxu0 %v2635_v26 }
 0x449   :  { %2111 = vmatprep.subr.bf16.mxu0 %v2458_v0 }
 0x44b   :  { %2088 = vmatmul.mubr.bf16.vlgmr.msra.gmra.mrb[32].mxu0 %v835_v56  ;;  %v2394_v56 = vld [vmem:[#allocation3 + $0x10] sm:$0xff]  }
 0x44c   :  { %2112 = vmatpush3.bf16.msra.mxu0 %v2581_v17  ;;  %2127 = vmatprep.mubr.msk.bf16.mxu0 %vm2459_vm0, %v2458_v0 }
 0x44d   :  { %2113 = vmatprep.subr.bf16.mxu0 %v2458_v0 }
 0x450   :  { %2114 = vmatpush3.bf16.msra.mxu0 %v2585_v18 }
 0x451   :  { %2115 = vmatprep.subr.bf16.mxu0 %v2458_v0 }
 0x454   :  { %2116 = vmatpush3.bf16.msra.mxu0 %v2597_v20 }
 0x455   :  { %2117 = vmatprep.subr.bf16.mxu0 %v2458_v0 }
 0x458   :  { %2118 = vmatpush3.bf16.msra.mxu0 %v2608_v22 }
 0x459   :  { %2119 = vmatprep.subr.bf16.mxu0 %v2458_v0 }
 0x45c   :  { %2120 = vmatpush3.bf16.msra.mxu0 %v2619_v24 }
 0x45d   :  { %2121 = vmatprep.subr.bf16.mxu0 %v2458_v0 }
 0x460   :  { %2122 = vmatpush3.bf16.msra.mxu0 %v2656_v29 }
 0x461   :  { %2123 = vmatprep.subr.bf16.mxu0 %v2458_v0 }
 0x464   :  { %2124 = vmatpush3.bf16.msra.mxu0 %v2661_v30 }
 0x465   :  { %2125 = vmatprep.subr.bf16.mxu0 %v2458_v0 }
 0x468   :  { %2126 = vmatpush3.bf16.msra.mxu0 %v2665_v31 }
 0x469   :  { %2151 = vmatprep.subr.bf16.mxu0 %v2458_v0 }
 0x4de   :  { %v785_v47 = vpop.f32.mrb[24].mxu0 }
 0x4df   :  { %v2009_v58 = vpop.f32.mrb[25].mxu0 }
 0x4e0   :  { %v788_v59 = vpop.f32.mrb[26].mxu0 }
 0x4e1   :  { %v2010_v60 = vpop.f32.mrb[27].mxu0 }
 0x4fe   :  { %v870_v61 = vpop.f32.mrb[28].mxu0 }
 0x4ff   :  { %v871_v62 = vadd.f32 %v870_v61, %v785_v47  ;;  %v2049_v63 = vpop.f32.mrb[29].mxu0 }
 0x500   :  { %v873_v1 = vpop.f32.mrb[30].mxu0 }
 0x501   :  { %v876_v2 = vadd.f32 %v2791_v7, %v871_v62  ;;  %v2050_v3 = vpop.f32.mrb[31].mxu0 }
 0x503   :  { %2364 = vtanh.f32 %v876_v2 }
 0x50d   :  { %v2365_v4 = vpop.eup %2364 }
 0x50e   :  { %v878_v5 = vpack.c.bf16 %v2365_v4, %v2365_v4 }
 0x510   :  { %2068 = vmatmul.mubr.bf16.vlgmr.msra.gmra.mrb[24].mxu1 %v878_v5 }
 0x511   :  { %2092 = vmatpush3.bf16.msra.mxu1 %v2677_v34  ;;  %2107 = vmatprep.mubr.msk.bf16.mxu1 %vm2459_vm0, %v2458_v0 }
 0x512   :  { %2093 = vmatprep.subr.bf16.mxu1 %v2458_v0 }
 0x515   :  { %2094 = vmatpush3.bf16.msra.mxu1 %v2686_v35 }
 0x516   :  { %2095 = vmatprep.subr.bf16.mxu1 %v2458_v0 }
 0x519   :  { %2096 = vmatpush3.bf16.msra.mxu1 %v2695_v36 }
 0x51a   :  { %2097 = vmatprep.subr.bf16.mxu1 %v2458_v0 }
 0x51d   :  { %2098 = vmatpush3.bf16.msra.mxu1 %v2702_v37 }
 0x51e   :  { %v955_v6 = vpop.f32.mrb[32].mxu0  ;;  %2099 = vmatprep.subr.bf16.mxu1 %v2458_v0 }
 0x51f   :  { %v961_v10 = vadd.f32 %v955_v6, %v2746_v53  ;;  %v2089_v11 = vpop.f32.mrb[33].mxu0 }
 0x520   :  { %v958_v44 = vpop.f32.mrb[34].mxu0 }
 0x521   :  { %2366 = vtanh.f32 %v961_v10  ;;  %2100 = vmatpush3.bf16.msra.mxu1 %v2710_v38  ;;  %v2090_v12 = vpop.f32.mrb[35].mxu0 }
 0x522   :  { %2101 = vmatprep.subr.bf16.mxu1 %v2458_v0 }
 0x525   :  { %2102 = vmatpush3.bf16.msra.mxu1 %v2717_v39 }
 0x526   :  { %2103 = vmatprep.subr.bf16.mxu1 %v2458_v0 }
 0x529   :  { %2104 = vmatpush3.bf16.msra.mxu1 %v2724_v40 }
 0x52a   :  { %2105 = vmatprep.subr.bf16.mxu1 %v2458_v0 }
 0x52b   :  { %v2367_v13 = vpop.eup %2366 }
 0x52c   :  { %v963_v14 = vpack.c.bf16 %v2367_v13, %v2367_v13 }
 0x52d   :  { %2106 = vmatpush3.bf16.msra.mxu1 %v2731_v41 }
 0x52e   :  { %2131 = vmatprep.subr.bf16.mxu1 %v2458_v0 }
 0x530   :  { %2108 = vmatmul.mubr.bf16.vlgmr.msra.gmra.mrb[28].mxu1 %v963_v14 }
 0x531   :  { %2132 = vmatpush3.bf16.msra.mxu1 %v2549_v8  ;;  %2147 = vmatprep.mubr.msk.bf16.mxu1 %vm2459_vm0, %v2458_v0 }
 0x532   :  { %2133 = vmatprep.subr.bf16.mxu1 %v2458_v0 }
 0x535   :  { %2134 = vmatpush3.bf16.msra.mxu1 %v2558_v9 }
 0x536   :  { %2135 = vmatprep.subr.bf16.mxu1 %v2458_v0 }
 0x539   :  { %2136 = vmatpush3.bf16.msra.mxu1 %v2578_v16 }
 0x53a   :  { %2137 = vmatprep.subr.bf16.mxu1 %v2458_v0 }
 0x53d   :  { %2138 = vmatpush3.bf16.msra.mxu1 %v2591_v19 }
 0x53e   :  { %2139 = vmatprep.subr.bf16.mxu1 %v2458_v0 }
 0x541   :  { %2140 = vmatpush3.bf16.msra.mxu1 %v2602_v21 }
 0x542   :  { %2141 = vmatprep.subr.bf16.mxu1 %v2458_v0 }
 0x545   :  { %2142 = vmatpush3.bf16.msra.mxu1 %v2613_v23 }
 0x546   :  { %2143 = vmatprep.subr.bf16.mxu1 %v2458_v0 }
 0x549   :  { %2144 = vmatpush3.bf16.msra.mxu1 %v2624_v25 }
 0x54a   :  { %2145 = vmatprep.subr.bf16.mxu1 %v2458_v0 }
 0x54d   :  { %2146 = vmatpush3.bf16.msra.mxu1 %v2635_v26 }
 0x54e   :  { %2171 = vmatprep.subr.bf16.mxu1 %v2458_v0 }
 0x550   :  { %2148 = vmatmul.mubr.bf16.vlgmr.msra.gmra.mrb[32].mxu1 %v963_v14 }
 0x551   :  { %2172 = vmatpush3.bf16.msra.mxu1 %v2581_v17  ;;  %2187 = vmatprep.mubr.msk.bf16.mxu1 %vm2459_vm0, %v2458_v0 }
 0x552   :  { %2173 = vmatprep.subr.bf16.mxu1 %v2458_v0 }
 0x555   :  { %2174 = vmatpush3.bf16.msra.mxu1 %v2585_v18 }
 0x556   :  { %2175 = vmatprep.subr.bf16.mxu1 %v2458_v0 }
 0x559   :  { %2176 = vmatpush3.bf16.msra.mxu1 %v2597_v20 }
 0x55a   :  { %2177 = vmatprep.subr.bf16.mxu1 %v2458_v0 }
 0x55d   :  { %2178 = vmatpush3.bf16.msra.mxu1 %v2608_v22 }
 0x55e   :  { %2179 = vmatprep.subr.bf16.mxu1 %v2458_v0 }
 0x561   :  { %2180 = vmatpush3.bf16.msra.mxu1 %v2619_v24 }
 0x562   :  { %2181 = vmatprep.subr.bf16.mxu1 %v2458_v0 }
 0x565   :  { %2182 = vmatpush3.bf16.msra.mxu1 %v2656_v29 }
 0x566   :  { %2183 = vmatprep.subr.bf16.mxu1 %v2458_v0 }
 0x569   :  { %2184 = vmatpush3.bf16.msra.mxu1 %v2661_v30 }
 0x56a   :  { %2185 = vmatprep.subr.bf16.mxu1 %v2458_v0 }
 0x56d   :  { %2186 = vmatpush3.bf16.msra.mxu1 %v2665_v31 }
 0x56e   :  { %2211 = vmatprep.subr.bf16.mxu1 %v2458_v0 }
 0x5e3   :  { %v913_v8 = vpop.f32.mrb[24].mxu1 }
 0x5e4   :  { %v2069_v9 = vpop.f32.mrb[25].mxu1 }
 0x5e5   :  { %v916_v16 = vpop.f32.mrb[26].mxu1 }
 0x5e6   :  { %v2070_v17 = vpop.f32.mrb[27].mxu1  ;;  %v2399_v16 = vld [vmem:[%s3232_s5] sm:$0xff]  }
 0x5e7   :  { %v2400_v17 = vld [vmem:[%s3232_s5 + $0x8] sm:$0xff]  }
 0x603   :  { %v998_v18 = vpop.f32.mrb[28].mxu1 }
 0x604   :  { %v999_v19 = vadd.f32 %v998_v18, %v913_v8  ;;  %v2109_v20 = vpop.f32.mrb[29].mxu1  ;;  %v2401_v18 = vld [vmem:[%s3232_s5 + $0x10] sm:$0xff]  }
 0x605   :  { %v1001_v21 = vpop.f32.mrb[30].mxu1 }
 0x606   :  { %v1004_v22 = vadd.f32 %v2791_v7, %v999_v19  ;;  %v2110_v23 = vpop.f32.mrb[31].mxu1  ;;  %v2402_v19 = vld [vmem:[%s3232_s5 + $0x18] sm:$0xff]  }
 0x608   :  { %2368 = vtanh.f32 %v1004_v22 }
 0x612   :  { %v2369_v24 = vpop.eup %2368 }
 0x613   :  { %v1006_v53 = vpack.c.bf16 %v2369_v24, %v2369_v24  ;;  %v2403_v24 = vld [vmem:[%s3232_s5 + $0x20] sm:$0xff]  }
 0x615   :  { %2128 = vmatmul.mubr.bf16.vlgmr.msra.gmra.mrb[36].mxu0 %v1006_v53 }
 0x616   :  { %2152 = vmatpush3.bf16.msra.mxu0 %v2677_v34  ;;  %2167 = vmatprep.mubr.msk.bf16.mxu0 %vm2459_vm0, %v2458_v0 }
 0x617   :  { %2153 = vmatprep.subr.bf16.mxu0 %v2458_v0 }
 0x61a   :  { %2154 = vmatpush3.bf16.msra.mxu0 %v2686_v35 }
 0x61b   :  { %2155 = vmatprep.subr.bf16.mxu0 %v2458_v0 }
 0x61e   :  { %2156 = vmatpush3.bf16.msra.mxu0 %v2695_v36 }
 0x61f   :  { %2157 = vmatprep.subr.bf16.mxu0 %v2458_v0 }
 0x622   :  { %2158 = vmatpush3.bf16.msra.mxu0 %v2702_v37 }
 0x623   :  { %v1083_v15 = vpop.f32.mrb[32].mxu1  ;;  %2159 = vmatprep.subr.bf16.mxu0 %v2458_v0 }
 0x624   :  { %v1089_v27 = vadd.f32 %v1083_v15, %v2750_v57  ;;  %v2149_v28 = vpop.f32.mrb[33].mxu1  ;;  %v3040_v57 = vld [vmem:[%s3230_s3] sm:$0xff]   ;;  %v2404_v15 = vld [vmem:[%s3232_s5 + $0x28] sm:$0xff]  }
 0x625   :  { %v1086_v32 = vpop.f32.mrb[34].mxu1 }
 0x626   :  { %2370 = vtanh.f32 %v1089_v27  ;;  %2160 = vmatpush3.bf16.msra.mxu0 %v2710_v38  ;;  %v2150_v33 = vpop.f32.mrb[35].mxu1  ;;  %v2406_v32 = vld [vmem:[%s3232_s5 + $0x38] sm:$0xff]  }
 0x627   :  { %2161 = vmatprep.subr.bf16.mxu0 %v2458_v0  ;;  %v2342_v33 = vld [vmem:[%s3235_s8] sm:$0xff]  }
 0x62a   :  { %2162 = vmatpush3.bf16.msra.mxu0 %v2717_v39 }
 0x62b   :  { %2163 = vmatprep.subr.bf16.mxu0 %v2458_v0 }
 0x62e   :  { %2164 = vmatpush3.bf16.msra.mxu0 %v2724_v40 }
 0x62f   :  { %2165 = vmatprep.subr.bf16.mxu0 %v2458_v0 }
 0x630   :  { %v2371_v42 = vpop.eup %2370 }
 0x631   :  { %v1091_v43 = vpack.c.bf16 %v2371_v42, %v2371_v42  ;;  %v2343_v42 = vld [vmem:[%s3235_s8 + $0x8] sm:$0xff]  }
 0x632   :  { %2166 = vmatpush3.bf16.msra.mxu0 %v2731_v41 }
 0x633   :  { %2191 = vmatprep.subr.bf16.mxu0 %v2458_v0 }
 0x635   :  { %2168 = vmatmul.mubr.bf16.vlgmr.msra.gmra.mrb[40].mxu0 %v1091_v43 }
 0x636   :  { %2192 = vmatpush3.bf16.msra.mxu0 %v3040_v57  ;;  %2207 = vmatprep.mubr.msk.bf16.mxu0 %vm2459_vm0, %v2458_v0 }
 0x637   :  { %2193 = vmatprep.subr.bf16.mxu0 %v2458_v0 }
 0x63a   :  { %2194 = vmatpush3.bf16.msra.mxu0 %v3049_v45 }
 0x63b   :  { %2195 = vmatprep.subr.bf16.mxu0 %v2458_v0 }
 0x63e   :  { %2196 = vmatpush3.bf16.msra.mxu0 %v3056_v46 }
 0x63f   :  { %2197 = vmatprep.subr.bf16.mxu0 %v2458_v0 }
 0x642   :  { %2198 = vmatpush3.bf16.msra.mxu0 %v3063_v48 }
 0x643   :  { %2199 = vmatprep.subr.bf16.mxu0 %v2458_v0 }
 0x646   :  { %2200 = vmatpush3.bf16.msra.mxu0 %v3070_v49 }
 0x647   :  { %2201 = vmatprep.subr.bf16.mxu0 %v2458_v0 }
 0x64a   :  { %2202 = vmatpush3.bf16.msra.mxu0 %v3077_v50 }
 0x64b   :  { %2203 = vmatprep.subr.bf16.mxu0 %v2458_v0 }
 0x64e   :  { %2204 = vmatpush3.bf16.msra.mxu0 %v2624_v25  ;;  %v2395_v25 = vld [vmem:[#allocation3 + $0x18] sm:$0xff]  }
 0x64f   :  { %2205 = vmatprep.subr.bf16.mxu0 %v2458_v0 }
 0x652   :  { %2206 = vmatpush3.bf16.msra.mxu0 %v2635_v26  ;;  %v2396_v26 = vld [vmem:[#allocation3 + $0x20] sm:$0xff]  }
 0x653   :  { %2231 = vmatprep.subr.bf16.mxu0 %v2458_v0 }
 0x655   :  { %2208 = vmatmul.mubr.bf16.vlgmr.msra.gmra.mrb[44].mxu0 %v1091_v43  ;;  %v2344_v43 = vld [vmem:[%s3235_s8 + $0x10] sm:$0xff]  }
 0x656   :  { %2232 = vmatpush3.bf16.msra.mxu0 %v2392_v52  ;;  %2247 = vmatprep.mubr.msk.bf16.mxu0 %vm2459_vm0, %v2458_v0 }
 0x657   :  { %2233 = vmatprep.subr.bf16.mxu0 %v2458_v0 }
 0x65a   :  { %2234 = vmatpush3.bf16.msra.mxu0 %v2393_v54 }
 0x65b   :  { %2235 = vmatprep.subr.bf16.mxu0 %v2458_v0 }
 0x65e   :  { %2236 = vmatpush3.bf16.msra.mxu0 %v2394_v56 }
 0x65f   :  { %2237 = vmatprep.subr.bf16.mxu0 %v2458_v0 }
 0x662   :  { %2238 = vmatpush3.bf16.msra.mxu0 %v2395_v25 }
 0x663   :  { %2239 = vmatprep.subr.bf16.mxu0 %v2458_v0 }
 0x666   :  { %2240 = vmatpush3.bf16.msra.mxu0 %v2396_v26 }
 0x667   :  { %2241 = vmatprep.subr.bf16.mxu0 %v2458_v0 }
 0x66a   :  { %2242 = vmatpush3.bf16.msra.mxu0 %v2656_v29 }
 0x66b   :  { %2243 = vmatprep.subr.bf16.mxu0 %v2458_v0 }
 0x66e   :  { %2244 = vmatpush3.bf16.msra.mxu0 %v2661_v30 }
 0x66f   :  { %2245 = vmatprep.subr.bf16.mxu0 %v2458_v0 }
 0x672   :  { %2246 = vmatpush3.bf16.msra.mxu0 %v2665_v31 }
 0x673   :  { %2271 = vmatprep.subr.bf16.mxu0 %v2458_v0 }
 0x6e8   :  { %v1041_v47 = vpop.f32.mrb[36].mxu0 }
 0x6e9   :  { %v2129_v58 = vpop.f32.mrb[37].mxu0 }
 0x6ea   :  { %v1044_v59 = vpop.f32.mrb[38].mxu0 }
 0x6eb   :  { %v2130_v60 = vpop.f32.mrb[39].mxu0 }
 0x708   :  { %v1126_v61 = vpop.f32.mrb[40].mxu0 }
 0x709   :  { %v1127_v62 = vadd.f32 %v1126_v61, %v1041_v47  ;;  %v2169_v63 = vpop.f32.mrb[41].mxu0 }
 0x70a   :  { %v1129_v1 = vpop.f32.mrb[42].mxu0 }
 0x70b   :  { %v1132_v29 = vadd.f32 %v2791_v7, %v1127_v62  ;;  %v2170_v2 = vpop.f32.mrb[43].mxu0 }
 0x70d   :  { %2372 = vtanh.f32 %v1132_v29 }
 0x717   :  { %v2373_v3 = vpop.eup %2372 }
 0x718   :  { %v1134_v30 = vpack.c.bf16 %v2373_v3, %v2373_v3 }
 0x71a   :  { %2188 = vmatmul.mubr.bf16.vlgmr.msra.gmra.mrb[36].mxu1 %v1134_v30 }
 0x71b   :  { %2212 = vmatpush3.bf16.msra.mxu1 %v2677_v34  ;;  %2227 = vmatprep.mubr.msk.bf16.mxu1 %vm2459_vm0, %v2458_v0 }
 0x71c   :  { %2213 = vmatprep.subr.bf16.mxu1 %v2458_v0 }
 0x71f   :  { %2214 = vmatpush3.bf16.msra.mxu1 %v2686_v35 }
 0x720   :  { %2215 = vmatprep.subr.bf16.mxu1 %v2458_v0 }
 0x723   :  { %2216 = vmatpush3.bf16.msra.mxu1 %v2695_v36 }
 0x724   :  { %2217 = vmatprep.subr.bf16.mxu1 %v2458_v0 }
 0x727   :  { %2218 = vmatpush3.bf16.msra.mxu1 %v2702_v37  ;;  %v2397_v37 = vld [vmem:[%s3230_s3 + $0x30] sm:$0xff]  }
 0x728   :  { %v1211_v31 = vpop.f32.mrb[44].mxu0  ;;  %2219 = vmatprep.subr.bf16.mxu1 %v2458_v0 }
 0x729   :  { %v1217_v34 = vadd.f32 %v1211_v31, %v2744_v51  ;;  %v2209_v4 = vpop.f32.mrb[45].mxu0 }
 0x72a   :  { %v1214_v5 = vpop.f32.mrb[46].mxu0 }
 0x72b   :  { %2374 = vtanh.f32 %v1217_v34  ;;  %2220 = vmatpush3.bf16.msra.mxu1 %v2710_v38  ;;  %v2210_v6 = vpop.f32.mrb[47].mxu0  ;;  %v2398_v38 = vld [vmem:[%s3230_s3 + $0x38] sm:$0xff]  }
 0x72c   :  { %2221 = vmatprep.subr.bf16.mxu1 %v2458_v0 }
 0x72f   :  { %2222 = vmatpush3.bf16.msra.mxu1 %v2717_v39 }
 0x730   :  { %2223 = vmatprep.subr.bf16.mxu1 %v2458_v0 }
 0x733   :  { %2224 = vmatpush3.bf16.msra.mxu1 %v2724_v40 }
 0x734   :  { %2225 = vmatprep.subr.bf16.mxu1 %v2458_v0 }
 0x735   :  { %v2375_v35 = vpop.eup %2374 }
 0x736   :  { %v1219_v36 = vpack.c.bf16 %v2375_v35, %v2375_v35 }
 0x737   :  { %2226 = vmatpush3.bf16.msra.mxu1 %v2731_v41 }
 0x738   :  { %2251 = vmatprep.subr.bf16.mxu1 %v2458_v0 }
 0x73a   :  { %2228 = vmatmul.mubr.bf16.vlgmr.msra.gmra.mrb[40].mxu1 %v1219_v36 }
 0x73b   :  { %2252 = vmatpush3.bf16.msra.mxu1 %v3040_v57  ;;  %2267 = vmatprep.mubr.msk.bf16.mxu1 %vm2459_vm0, %v2458_v0  ;;  %v2345_v57 = vld [vmem:[%s3235_s8 + $0x18] sm:$0xff]  }
 0x73c   :  { %2253 = vmatprep.subr.bf16.mxu1 %v2458_v0 }
 0x73f   :  { %2254 = vmatpush3.bf16.msra.mxu1 %v3049_v45  ;;  %v2346_v45 = vld [vmem:[%s3235_s8 + $0x20] sm:$0xff]  }
 0x740   :  { %2255 = vmatprep.subr.bf16.mxu1 %v2458_v0 }
 0x743   :  { %2256 = vmatpush3.bf16.msra.mxu1 %v3056_v46  ;;  %v2347_v46 = vld [vmem:[%s3235_s8 + $0x28] sm:$0xff]  }
 0x744   :  { %2257 = vmatprep.subr.bf16.mxu1 %v2458_v0 }
 0x747   :  { %2258 = vmatpush3.bf16.msra.mxu1 %v3063_v48  ;;  %v2348_v48 = vld [vmem:[%s3235_s8 + $0x30] sm:$0xff]  }
 0x748   :  { %2259 = vmatprep.subr.bf16.mxu1 %v2458_v0 }
 0x74b   :  { %2260 = vmatpush3.bf16.msra.mxu1 %v3070_v49  ;;  %v2349_v49 = vld [vmem:[%s3235_s8 + $0x38] sm:$0xff]   ;;  %s2460_s8 = smov [#allocation6]  }
 0x74c   :  { %2261 = vmatprep.subr.bf16.mxu1 %v2458_v0 }
 0x74f   :  { %2262 = vmatpush3.bf16.msra.mxu1 %v3077_v50 }
 0x750   :  { %2263 = vmatprep.subr.bf16.mxu1 %v2458_v0 }
 0x753   :  { %2264 = vmatpush3.bf16.msra.mxu1 %v2397_v37 }
 0x754   :  { %2265 = vmatprep.subr.bf16.mxu1 %v2458_v0 }
 0x757   :  { %2266 = vmatpush3.bf16.msra.mxu1 %v2398_v38 }
 0x758   :  { %2291 = vmatprep.subr.bf16.mxu1 %v2458_v0 }
 0x75a   :  { %2268 = vmatmul.mubr.bf16.vlgmr.msra.gmra.mrb[44].mxu1 %v1219_v36 }
 0x75b   :  { %2307 = vmatprep.mubr.msk.bf16.mxu1 %vm2459_vm0, %v2458_v0  ;;  %2292 = vmatpush3.bf16.msra.mxu1 %v2342_v33 }
 0x75c   :  { %2293 = vmatprep.subr.bf16.mxu1 %v2458_v0 }
 0x75f   :  { %2294 = vmatpush3.bf16.msra.mxu1 %v2343_v42 }
 0x760   :  { %2295 = vmatprep.subr.bf16.mxu1 %v2458_v0 }
 0x763   :  { %2296 = vmatpush3.bf16.msra.mxu1 %v2344_v43 }
 0x764   :  { %2297 = vmatprep.subr.bf16.mxu1 %v2458_v0 }
 0x767   :  { %2298 = vmatpush3.bf16.msra.mxu1 %v2345_v57 }
 0x768   :  { %2299 = vmatprep.subr.bf16.mxu1 %v2458_v0 }
 0x76b   :  { %2300 = vmatpush3.bf16.msra.mxu1 %v2346_v45 }
 0x76c   :  { %2301 = vmatprep.subr.bf16.mxu1 %v2458_v0 }
 0x76f   :  { %2302 = vmatpush3.bf16.msra.mxu1 %v2347_v46 }
 0x770   :  { %2303 = vmatprep.subr.bf16.mxu1 %v2458_v0 }
 0x773   :  { %2304 = vmatpush3.bf16.msra.mxu1 %v2348_v48 }
 0x774   :  { %2305 = vmatprep.subr.bf16.mxu1 %v2458_v0 }
 0x777   :  { %2306 = vmatpush3.bf16.msra.mxu1 %v2349_v49 }
 0x7ed   :  { %v1169_v39 = vpop.f32.mrb[36].mxu1 }
 0x7ee   :  { %v2189_v40 = vpop.f32.mrb[37].mxu1 }
 0x7ef   :  { %v1172_v41 = vpop.f32.mrb[38].mxu1 }
 0x7f0   :  { %v2190_v51 = vpop.f32.mrb[39].mxu1 }
 0x80d   :  { %v1254_v10 = vpop.f32.mrb[40].mxu1 }
 0x80e   :  { %v1255_v11 = vadd.f32 %v1254_v10, %v1169_v39  ;;  %v2229_v44 = vpop.f32.mrb[41].mxu1 }
 0x80f   :  { %v1257_v12 = vpop.f32.mrb[42].mxu1 }
 0x810   :  { %v1260_v13 = vadd.f32 %v2791_v7, %v1255_v11  ;;  %v2230_v14 = vpop.f32.mrb[43].mxu1 }
 0x812   :  { %2376 = vtanh.f32 %v1260_v13 }
 0x81c   :  { %v2377_v8 = vpop.eup %2376 }
 0x81d   :  { %v1262_v9 = vpack.c.bf16 %v2377_v8, %v2377_v8 }
 0x81f   :  { %2248 = vmatmul.mubr.bf16.vlgmr.msra.gmra.mrb[48].mxu0 %v1262_v9 }
 0x820   :  { %2272 = vmatpush3.bf16.msra.mxu0 %v2399_v16  ;;  %2287 = vmatprep.mubr.msk.bf16.mxu0 %vm2459_vm0, %v2458_v0 }
 0x821   :  { %2273 = vmatprep.subr.bf16.mxu0 %v2458_v0 }
 0x824   :  { %2274 = vmatpush3.bf16.msra.mxu0 %v2400_v17 }
 0x825   :  { %2275 = vmatprep.subr.bf16.mxu0 %v2458_v0 }
 0x828   :  { %2276 = vmatpush3.bf16.msra.mxu0 %v2401_v18 }
 0x829   :  { %2277 = vmatprep.subr.bf16.mxu0 %v2458_v0 }
 0x82c   :  { %2278 = vmatpush3.bf16.msra.mxu0 %v2402_v19 }
 0x82d   :  { %v1339_v20 = vpop.f32.mrb[44].mxu1  ;;  %2279 = vmatprep.subr.bf16.mxu0 %v2458_v0 }
 0x82e   :  { %v1345_v21 = vadd.f32 %v1339_v20, %v2748_v55  ;;  %v2269_v22 = vpop.f32.mrb[45].mxu1  ;;  %v2405_v55 = vld [vmem:[%s3232_s5 + $0x30] sm:$0xff]  }
 0x82f   :  { %v1342_v23 = vpop.f32.mrb[46].mxu1 }
 0x830   :  { %2378 = vtanh.f32 %v1345_v21  ;;  %2280 = vmatpush3.bf16.msra.mxu0 %v2403_v24  ;;  %v2270_v53 = vpop.f32.mrb[47].mxu1 }
 0x831   :  { %2281 = vmatprep.subr.bf16.mxu0 %v2458_v0 }
 0x834   :  { %2282 = vmatpush3.bf16.msra.mxu0 %v2404_v15 }
 0x835   :  { %2283 = vmatprep.subr.bf16.mxu0 %v2458_v0 }
 0x838   :  { %2284 = vmatpush3.bf16.msra.mxu0 %v2405_v55 }
 0x839   :  { %2285 = vmatprep.subr.bf16.mxu0 %v2458_v0  ;;  %v1562_v0 = vld [vmem:[%s3236_s9] ss:$0 sm:$0xff]  ;;  %s1521_s9 = sshll.u32 %s2460_s8, 4  ;;  %s1522_s9 = int_to_ptr.vmem [resolvable:$true] %s1521_s9 }
 0x83a   :  { %v2379_v27 = vpop.eup %2378  ;;  %s2429_s6 = scalar_lea.vmem %s1522_s9, 128  ;;  %p2434_p9 = scmp.lt.s32.totalorder %s1522_s9, %s1522_s9 }
 0x83b   :  { %v1347_v28 = vpack.c.bf16 %v2379_v27, %v2379_v27  ;;  %p2430_p8 = scmp.ne.s32.totalorder %s1522_s9, %s2429_s6  ;;  %p2435_p10 = scmp.lt.s32.totalorder %s2429_s6, %s2429_s6 }
 0x83c   :  { %2286 = vmatpush3.bf16.msra.mxu0 %v2406_v32 }
 0x83d   :  { %p2436_p11 = por %p2435_p10, %p2434_p9 }
 0x83f   :  { %2288 = vmatmul.mubr.bf16.vlgmr.msra.gmra.mrb[52].mxu0 %v1347_v28  ;;  %p2437_p12 = pnand %p2436_p11, %p2430_p8 }
 0x8f2   :  { %v1297_v50 = vpop.f32.mrb[48].mxu0 }
 0x8f3   :  { %v2249_v52 = vpop.f32.mrb[49].mxu0 }
 0x8f4   :  { %v1300_v54 = vpop.f32.mrb[50].mxu0 }
 0x8f5   :  { %v2250_v56 = vpop.f32.mrb[51].mxu0 }
 0x912   :  { %v1382_v25 = vpop.f32.mrb[52].mxu0 }
 0x913   :  { %v1383_v26 = vadd.f32 %v1382_v25, %v1297_v50  ;;  %v2289_v47 = vpop.f32.mrb[53].mxu0 }
 0x914   :  { %v1385_v58 = vpop.f32.mrb[54].mxu0 }
 0x915   :  { %v1388_v59 = vadd.f32 %v2791_v7, %v1383_v26  ;;  %v2290_v60 = vpop.f32.mrb[55].mxu0 }
 0x917   :  { %2380 = vtanh.f32 %v1388_v59 }
 0x921   :  { %v2381_v61 = vpop.eup %2380 }
 0x922   :  { %v1390_v62 = vpack.c.bf16 %v2381_v61, %v2381_v61 }
 0x924   :  { %2308 = vmatmul.mubr.bf16.vlgmr.msra.gmra.mrb[48].mxu1 %v1390_v62 }
 0x9f7   :  { %v1496_v63 = vpop.f32.mrb[48].mxu1 }
 0x9f8   :  { %v1497_v1 = vadd.f32 %v1562_v0, %v1496_v63  ;;  %v2309_v29 = vpop.f32.mrb[49].mxu1 }
 0x9f9   :  { %v1499_v2 = vpop.f32.mrb[50].mxu1 }
 0x9fa   :  { %v2310_v3 = vpop.f32.mrb[51].mxu1  ;;  %v1503_v30 = vsel %vm1502_vm2, %v1497_v1, -inf }
 0x9fb   :  { %1504 = vmax.xlane.f32.xlu0 %v1503_v30 }
 0xa88   :  { %v1505_v31 = vpop.xlane.xlu0 %1504 }
 0xa89   :  { %v1506_v7 = vsub.f32 %v1497_v1, %v1505_v31 }
 0xa8b   :  { %v1507_v34 = vmul.f32 1.442695, %v1506_v7 }
 0xa8d   :  { %2382 = vpow2.f32 %v1507_v34 }
 0xa97   :  { %v2383_v4 = vpop.eup %2382 }
 0xa98   :  { %v1509_v5 = vsel %vm1502_vm2, %v2383_v4, 0.0 }
 0xa99   :  { %1510 = vadd.xlane.f32.xlu0 %v1509_v5 }
 0xb26   :  { %v1511_v6 = vpop.xlane.xlu0 %1510 }
 0xb27   :  { %2384 = vrcp.f32 %v1511_v6 }
 0xb31   :  { %v2385_v35 = vpop.eup %2384 }
 0xb32   :  { %v1513_v36 = vmul.f32 %v2385_v35, %v2383_v4 }
 0xb34   :  { %1514 = vst.msk [vmem:[#allocation6] sm:$0xff] %vm1502_vm2, %v1513_v36 }
 0xb35   :  { %2440 = shalt.err (!%p2437_p12)
}
 0xb36   :  { %s2441_s4 = scalar_lea.hbm %s3237_s10, 128 }
 0xb37   :  { %p2442_p13 = scmp.ne.s32.totalorder %s3237_s10, %s2441_s4  ;;  %p2445_p0 = scmp.lt.u32.totalorder %s2441_s4, %s3237_s10 }
 0xb39   :  { %p2447_p1 = pnand %p2445_p0, %p2442_p13 }
 0xb3b   :  { %2450 = shalt.err (!%p2447_p1)
}
 0xb3c   :  { %1524 = dma.vmem_to_hbm [thread:$0]  %s1522_s9, 128, %s3237_s10, [#allocation5]  }
 0xb3d   :  { %2453 = dma.done.wait [#allocation5], 128  }
 0xb3e   :  { %2454 = vsyncadd [#allocation5], 4294967168 }
 0xb3f   :  { %1528 = vsyncpa [#allocation4], 1 }
 0xb40   :  { %1529 = vsyncpa [#allocation5], 1 }

</bundles_post_ra>
